<compile_context>
chip_gen: v5e
topology: v5e:2x2
jax: 0.10.0
libtpu: 0.0.40
codegen_flags: <defaults>
</compile_context>

<pallas_src>
import functools

import jax
import jax.numpy as jnp
from jax import lax
from jax.experimental import pallas as pl
from jax.experimental.pallas import tpu as pltpu


# ---------------------------------------------------------------- helpers ---
def _layernorm(x, scale, shift, eps=1e-5):
    # mean / biased variance over the last dim, exactly like the PyTorch module
    mean = jnp.mean(x, axis=-1, keepdims=True)
    var = jnp.mean((x - mean) ** 2, axis=-1, keepdims=True)
    return scale * ((x - mean) / jnp.sqrt(var + eps)) + shift


def _gelu_tanh(x):
    # 0.5 * x * (1 + tanh(sqrt(2/pi) * (x + 0.044715 * x**3)))
    c = jnp.sqrt(2.0 / jnp.pi).astype(x.dtype)
    return 0.5 * x * (1.0 + jnp.tanh(c * (x + 0.044715 * (x ** 3))))


def _largest_divisor_at_most(n, cap):
    cap = max(1, min(n, cap))
    for c in range(cap, 0, -1):
        if n % c == 0:
            return c
    return 1


# ----------------------------------------------------------------- kernel ---
def transformer_block_kernel(
    x_ref,                         # (Bt, T, D)   input block, f32
    ln1_s_ref, ln1_b_ref,          # (1, D)       f32
    wqkv_ref,                      # (D, 3D)      matmul dtype, [in, out]
    wo_ref, bo_ref,                # (D, D), (1, D)
    ln2_s_ref, ln2_b_ref,          # (1, D)
    w1_ref, b1_ref,                # (D, th), (1, th)     FFN tile
    w2_ref, b2_ref,                # (th, D), (1, D)
    o_ref,                         # (Bt, T, D)
    x1_sc,                         # (Bt*T, D) f32  : x + attention residual
    h2_sc,                         # (Bt*T, D) mdt  : LN2 output (matmul operand)
    acc_sc,                        # (Bt*T, D) f32  : FFN accumulator
    *, num_heads,
):
    k_idx = pl.program_id(1)
    bt, seq, emb = x_ref.shape
    rows = bt * seq
    hd = emb // num_heads
    mdt = wqkv_ref.dtype                      # MXU operand dtype (bf16 or f32)

    # ---- phase 1 (first FFN tile only): LN1 + causal attention + residual ----
    @pl.when(k_idx == 0)
    def _attention():
        x = x_ref[...].astype(jnp.float32).reshape(rows, emb)
        h = _layernorm(x, ln1_s_ref[...], ln1_b_ref[...])

        # fused QKV projection, batch folded into the M dimension
        qkv = jnp.dot(h.astype(mdt), wqkv_ref[...],
                      preferred_element_type=jnp.float32)          # (rows, 3D)
        q = qkv[:, :emb] * (1.0 / (hd ** 0.5))     # fold 1/sqrt(hd) into q
        kk = qkv[:, emb:2 * emb]
        vv = qkv[:, 2 * emb:]

        # causal mask: built once per block, reused by every head
        row = lax.broadcasted_iota(jnp.int32, (seq, seq), 0)
        col = lax.broadcasted_iota(jnp.int32, (seq, seq), 1)
        causal = col <= row

        ctx_heads = []
        for hh in range(num_heads):                # static unroll (H is small)
            sl = slice(hh * hd, (hh + 1) * hd)
            qh = q[:, sl].reshape(bt, seq, hd).astype(mdt)
            kh = kk[:, sl].reshape(bt, seq, hd).astype(mdt)
            vh = vv[:, sl].reshape(bt, seq, hd).astype(mdt)
            s = jnp.einsum('bqd,bkd->bqk', qh, kh,
                           preferred_element_type=jnp.float32)     # (bt, T, T)
            s = jnp.where(causal, s, -jnp.inf)
            m = jnp.max(s, axis=-1, keepdims=True)
            e = jnp.exp(s - m)
            p = e * pl.reciprocal(jnp.sum(e, axis=-1, keepdims=True), approx=True)
            ctx_heads.append(
                jnp.einsum('bqk,bkd->bqd', p.astype(mdt), vh,
                           preferred_element_type=jnp.float32))
        ctx = jnp.concatenate(ctx_heads, axis=-1).reshape(rows, emb)

        attn = jnp.dot(ctx.astype(mdt), wo_ref[...],
                       preferred_element_type=jnp.float32) + bo_ref[...]
        x1 = x + attn                              # first residual
        x1_sc[...] = x1
        h2_sc[...] = _layernorm(x1, ln2_s_ref[...],
                                ln2_b_ref[...]).astype(h2_sc.dtype)
        acc_sc[...] = jnp.zeros_like(acc_sc)

    # ---- phase 2 (every FFN tile): accumulate GELU-MLP over the hidden dim ----
    ff1 = jnp.dot(h2_sc[...], w1_ref[...],
                  preferred_element_type=jnp.float32) + b1_ref[...]
    ff1 = _gelu_tanh(ff1)                          # f32 VPU/EUP work
    acc_sc[...] += jnp.dot(ff1.astype(mdt), w2_ref[...],
                           preferred_element_type=jnp.float32)

    # ---- phase 3 (last FFN tile): second residual + writeback ----
    @pl.when(k_idx == pl.num_programs(1) - 1)
    def _finalize():
        out = x1_sc[...] + acc_sc[...] + b2_ref[...]
        o_ref[...] = out.reshape(bt, seq, emb).astype(o_ref.dtype)


# ---------------------------------------------------------------- wrapper ---
def transformer_block(x, params, num_heads, *,
                      block_b=None, ffn_block=None,
                      matmul_dtype=jnp.bfloat16):
    B, T, D = x.shape
    H4 = 4 * D
    assert D % num_heads == 0

    # Fold batch into the matmul M dimension (aim for ~128 rows per block).
    # NOTE(v7x): when batch allows, keep >= 2 batch blocks so the "parallel"
    # grid axis shards across the two TensorCores.
    if block_b is None:
        block_b = _largest_divisor_at_most(B, max(1, 128 // T))
    assert B % block_b == 0

    # FFN hidden-dim tile (reduction axis + VMEM accumulator) so W1/W2 are
    # streamed instead of fully VMEM-resident.
    if ffn_block is None:
        if H4 % 128 == 0:
            ffn_block = 128 * _largest_divisor_at_most(H4 // 128, 4)   # <= 512
        else:
            ffn_block = H4
    assert H4 % ffn_block == 0

    grid = (B // block_b, H4 // ffn_block)
    rows = block_b * T
    f32 = jnp.float32

    # Pre-transpose every weight to [in, out] and fuse QKV (done once in XLA,
    # free layout plumbing); cast MXU operands to matmul_dtype.
    wqkv = jnp.concatenate(
        [params["wq"].T, params["wk"].T, params["wv"].T], axis=1
    ).astype(matmul_dtype)                                   # (D, 3D)
    wo = params["wo"].T.astype(matmul_dtype)                 # (D, D)
    w1 = params["w1"].T.astype(matmul_dtype)                 # (D, 4D)
    w2 = params["w2"].T.astype(matmul_dtype)                 # (4D, D)
    # LN params / biases stay f32 (elementwise work stays f32 on all gens).
    ln1_s = params["ln1_scale"].astype(f32).reshape(1, D)
    ln1_b = params["ln1_shift"].astype(f32).reshape(1, D)
    ln2_s = params["ln2_scale"].astype(f32).reshape(1, D)
    ln2_b = params["ln2_shift"].astype(f32).reshape(1, D)
    bo = params["bo"].astype(f32).reshape(1, D)
    b1 = params["b1"].astype(f32).reshape(1, H4)
    b2 = params["b2"].astype(f32).reshape(1, D)

    def rep(shape):   # grid-invariant (fully resident) block
        return pl.BlockSpec(shape, lambda b, k: (0, 0))

    in_specs = [
        pl.BlockSpec((block_b, T, D), lambda b, k: (b, 0, 0)),   # x
        rep((1, D)), rep((1, D)),                                # ln1 scale/shift
        rep((D, 3 * D)),                                         # Wqkv [in,out]
        rep((D, D)), rep((1, D)),                                # Wo, bo
        rep((1, D)), rep((1, D)),                                # ln2 scale/shift
        pl.BlockSpec((D, ffn_block), lambda b, k: (0, k)),       # W1 tile
        pl.BlockSpec((1, ffn_block), lambda b, k: (0, k)),       # b1 tile
        pl.BlockSpec((ffn_block, D), lambda b, k: (k, 0)),       # W2 tile
        rep((1, D)),                                             # b2
    ]

    kernel = functools.partial(transformer_block_kernel, num_heads=num_heads)

    return pl.pallas_call(
        kernel,
        out_shape=jax.ShapeDtypeStruct((B, T, D), x.dtype),
        grid_spec=pltpu.PrefetchScalarGridSpec(
            num_scalar_prefetch=0,
            grid=grid,
            in_specs=in_specs,
            out_specs=pl.BlockSpec((block_b, T, D), lambda b, k: (b, 0, 0)),
            scratch_shapes=[
                pltpu.VMEM((rows, D), jnp.float32),     # x + attn residual
                pltpu.VMEM((rows, D), matmul_dtype),    # LN2 output
                pltpu.VMEM((rows, D), jnp.float32),     # FFN accumulator
            ],
        ),
        compiler_params=pltpu.CompilerParams(
            dimension_semantics=("parallel", "arbitrary"),
            vmem_limit_bytes=64 * 1024 * 1024,
        ),
    )(x, ln1_s, ln1_b, wqkv, wo, bo, ln2_s, ln2_b, w1, b1, w2, b2)


# ------------------------------------------------------------- pure-JAX ref --
def _reference_forward(x, params, num_heads):
    B, T, D = x.shape
    hd = D // num_heads

    def ln(v, s, b):
        m = jnp.mean(v, -1, keepdims=True)
        var = jnp.mean((v - m) ** 2, -1, keepdims=True)
        return s * ((v - m) / jnp.sqrt(var + 1e-5)) + b

    h = ln(x, params["ln1_scale"], params["ln1_shift"])
    q = (h @ params["wq"].T).reshape(B, T, num_heads, hd).transpose(0, 2, 1, 3)
    k = (h @ params["wk"].T).reshape(B, T, num_heads, hd).transpose(0, 2, 1, 3)
    v = (h @ params["wv"].T).reshape(B, T, num_heads, hd).transpose(0, 2, 1, 3)
    s = jnp.einsum("bhqd,bhkd->bhqk", q, k)
    mask = jnp.tril(jnp.ones((T, T), bool))
    s = jnp.where(mask, s, -jnp.inf)
    w = jax.nn.softmax(s / (hd ** 0.5), axis=-1)
    ctx = jnp.einsum("bhqk,bhkd->bhqd", w, v).transpose(0, 2, 1, 3).reshape(B, T, D)
    x1 = x + ctx @ params["wo"].T + params["bo"]
    h2 = ln(x1, params["ln2_scale"], params["ln2_shift"])
    ff = _gelu_tanh(h2 @ params["w1"].T + params["b1"])
    return x1 + ff @ params["w2"].T + params["b2"]


# ------------------------------------------------------------------- main ---
if __name__ == "__main__":
    # cfg = {emb_dim: 32, context_length: 8, n_heads: 4, drop_rate: 0.0, qkv_bias: False}
    B, T, D, H = 2, 8, 32, 4
    H4 = 4 * D

    key = jax.random.PRNGKey(0)
    ks = jax.random.split(key, 8)
    x = jax.random.normal(ks[0], (B, T, D), dtype=jnp.float32)

    def init(k, shape, scale=0.05):
        return (scale * jax.random.normal(k, shape)).astype(jnp.float32)

    params = {
        "ln1_scale": jnp.ones((1, D), jnp.float32),
        "ln1_shift": jnp.zeros((1, D), jnp.float32),
        "wq": init(ks[1], (D, D)),
        "wk": init(ks[2], (D, D)),
        "wv": init(ks[3], (D, D)),
        "wo": init(ks[4], (D, D)),
        "bo": jnp.zeros((1, D), jnp.float32),
        "ln2_scale": jnp.ones((1, D), jnp.float32),
        "ln2_shift": jnp.zeros((1, D), jnp.float32),
        "w1": init(ks[5], (H4, D)),
        "b1": jnp.zeros((1, H4), jnp.float32),
        "w2": init(ks[6], (D, H4)),
        "b2": jnp.zeros((1, D), jnp.float32),
    }

    out = jax.block_until_ready(transformer_block(x, params, num_heads=H))
    ref = _reference_forward(x, params, H)

    assert out.shape == (B, T, D)
    assert bool(jnp.all(jnp.isfinite(out)))
    err = float(jnp.max(jnp.abs(out - ref)))
    # bf16 MXU operands + approx reciprocal => loose tolerance vs the f32 reference.
    assert err < 1e-1, f"max abs err vs reference: {err}"
    print("KERNEL_OK")
</pallas_src>

<mosaic_0001>
module attributes {stable_mosaic.version = 11 : i64} {
  func.func @transformer_block_kernel(%arg0: i32, %arg1: i32, %arg2: memref<2x8x32xf32, #tpu.memory_space<vmem>>, %arg3: memref<1x32xf32, #tpu.memory_space<vmem>>, %arg4: memref<1x32xf32, #tpu.memory_space<vmem>>, %arg5: memref<32x96xbf16, #tpu.memory_space<vmem>>, %arg6: memref<32x32xbf16, #tpu.memory_space<vmem>>, %arg7: memref<1x32xf32, #tpu.memory_space<vmem>>, %arg8: memref<1x32xf32, #tpu.memory_space<vmem>>, %arg9: memref<1x32xf32, #tpu.memory_space<vmem>>, %arg10: memref<32x128xbf16, #tpu.memory_space<vmem>>, %arg11: memref<1x128xf32, #tpu.memory_space<vmem>>, %arg12: memref<128x32xbf16, #tpu.memory_space<vmem>>, %arg13: memref<1x32xf32, #tpu.memory_space<vmem>>, %arg14: memref<2x8x32xf32, #tpu.memory_space<vmem>>, %arg15: memref<16x32xf32, #tpu.memory_space<vmem>>, %arg16: memref<16x32xbf16, #tpu.memory_space<vmem>>, %arg17: memref<16x32xf32, #tpu.memory_space<vmem>>) attributes {dimension_semantics = [#tpu.dimension_semantics<parallel>, #tpu.dimension_semantics<arbitrary>], iteration_bounds = array<i64: 1, 1>, scalar_prefetch = 0 : i64, scratch_operands = 3 : i64, tpu.core_type = #tpu.core_type<tc>, window_params = [{transform_indices = @transform_0, window_bounds = array<i64: 2, 8, 32>}, {pipeline_mode = #tpu.pipeline_mode<synchronous>, transform_indices = @transform_1, window_bounds = array<i64: 1, 32>}, {pipeline_mode = #tpu.pipeline_mode<synchronous>, transform_indices = @transform_2, window_bounds = array<i64: 1, 32>}, {pipeline_mode = #tpu.pipeline_mode<synchronous>, transform_indices = @transform_3, window_bounds = array<i64: 32, 96>}, {pipeline_mode = #tpu.pipeline_mode<synchronous>, transform_indices = @transform_4, window_bounds = array<i64: 32, 32>}, {pipeline_mode = #tpu.pipeline_mode<synchronous>, transform_indices = @transform_5, window_bounds = array<i64: 1, 32>}, {pipeline_mode = #tpu.pipeline_mode<synchronous>, transform_indices = @transform_6, window_bounds = array<i64: 1, 32>}, {pipeline_mode = #tpu.pipeline_mode<synchronous>, transform_indices = @transform_7, window_bounds = array<i64: 1, 32>}, {transform_indices = @transform_8, window_bounds = array<i64: 32, 128>}, {transform_indices = @transform_9, window_bounds = array<i64: 1, 128>}, {transform_indices = @transform_10, window_bounds = array<i64: 128, 32>}, {pipeline_mode = #tpu.pipeline_mode<synchronous>, transform_indices = @transform_11, window_bounds = array<i64: 1, 32>}, {transform_indices = @transform_12, window_bounds = array<i64: 2, 8, 32>}]} {
    %c0_i32 = arith.constant 0 : i32
    %0 = arith.cmpi eq, %arg1, %c0_i32 : i32
    %1 = arith.extui %0 : i1 to i32
    %c0_i32_0 = arith.constant 0 : i32
    %2 = arith.cmpi ne, %1, %c0_i32_0 : i32
    scf.if %2 {
      %c0_19 = arith.constant 0 : index
      %c0_20 = arith.constant 0 : index
      %c0_21 = arith.constant 0 : index
      %32 = vector.load %arg2[%c0_19, %c0_20, %c0_21] : memref<2x8x32xf32, #tpu.memory_space<vmem>>, vector<2x8x32xf32>
      %33 = vector.shape_cast %32 : vector<2x8x32xf32> to vector<16x32xf32>
      %c0_22 = arith.constant 0 : index
      %c0_23 = arith.constant 0 : index
      %34 = vector.load %arg3[%c0_22, %c0_23] : memref<1x32xf32, #tpu.memory_space<vmem>>, vector<1x32xf32>
      %c0_24 = arith.constant 0 : index
      %c0_25 = arith.constant 0 : index
      %35 = vector.load %arg4[%c0_24, %c0_25] : memref<1x32xf32, #tpu.memory_space<vmem>>, vector<1x32xf32>
      %cst_26 = arith.constant dense<0.000000e+00> : vector<16xf32>
      %36 = vector.multi_reduction <add>, %33, %cst_26 [1] : vector<16x32xf32> to vector<16xf32>
      %37 = vector.shape_cast %36 : vector<16xf32> to vector<16x1xf32>
      %cst_27 = arith.constant 3.200000e+01 : f32
      %38 = vector.broadcast %cst_27 : f32 to vector<16x1xf32>
      %39 = arith.divf %37, %38 : vector<16x1xf32>
      %40 = vector.broadcast %39 : vector<16x1xf32> to vector<16x32xf32>
      %41 = arith.subf %33, %40 : vector<16x32xf32>
      %42 = arith.mulf %41, %41 : vector<16x32xf32>
      %cst_28 = arith.constant dense<0.000000e+00> : vector<16xf32>
      %43 = vector.multi_reduction <add>, %42, %cst_28 [1] : vector<16x32xf32> to vector<16xf32>
      %44 = vector.shape_cast %43 : vector<16xf32> to vector<16x1xf32>
      %cst_29 = arith.constant 3.200000e+01 : f32
      %45 = vector.broadcast %cst_29 : f32 to vector<16x1xf32>
      %46 = arith.divf %44, %45 : vector<16x1xf32>
      %47 = vector.broadcast %39 : vector<16x1xf32> to vector<16x32xf32>
      %48 = arith.subf %33, %47 : vector<16x32xf32>
      %cst_30 = arith.constant 9.99999974E-6 : f32
      %49 = vector.broadcast %cst_30 : f32 to vector<16x1xf32>
      %50 = arith.addf %46, %49 : vector<16x1xf32>
      %51 = math.sqrt %50 : vector<16x1xf32>
      %52 = vector.broadcast %51 : vector<16x1xf32> to vector<16x32xf32>
      %53 = arith.divf %48, %52 : vector<16x32xf32>
      %54 = vector.broadcast %34 : vector<1x32xf32> to vector<16x32xf32>
      %55 = arith.mulf %54, %53 : vector<16x32xf32>
      %56 = vector.broadcast %35 : vector<1x32xf32> to vector<16x32xf32>
      %57 = arith.addf %55, %56 : vector<16x32xf32>
      %58 = arith.truncf %57 : vector<16x32xf32> to vector<16x32xbf16>
      %c0_31 = arith.constant 0 : index
      %c0_32 = arith.constant 0 : index
      %59 = vector.load %arg5[%c0_31, %c0_32] : memref<32x96xbf16, #tpu.memory_space<vmem>>, vector<32x96xbf16>
      %cst_33 = arith.constant dense<0.000000e+00> : vector<16x96xf32>
      %60 = tpu.matmul %58, %59, %cst_33 {dimension_numbers = #tpu.dot_dimension_numbers<[1], [0], [0], [1], [0, 0, 1, 1], [], []>} : vector<16x32xbf16>, vector<32x96xbf16>, vector<16x96xf32> -> vector<16x96xf32>
      %61 = vector.extract_strided_slice %60 {offsets = [0, 0], sizes = [16, 32], strides = [1, 1]} : vector<16x96xf32> to vector<16x32xf32>
      %cst_34 = arith.constant 0.353553385 : f32
      %62 = vector.broadcast %cst_34 : f32 to vector<16x32xf32>
      %63 = arith.mulf %61, %62 : vector<16x32xf32>
      %64 = vector.extract_strided_slice %60 {offsets = [0, 32], sizes = [16, 32], strides = [1, 1]} : vector<16x96xf32> to vector<16x32xf32>
      %65 = vector.extract_strided_slice %60 {offsets = [0, 64], sizes = [16, 32], strides = [1, 1]} : vector<16x96xf32> to vector<16x32xf32>
      %66 = tpu.iota {dimensions = array<i32: 0>} : vector<8x8xi32>
      %67 = tpu.iota {dimensions = array<i32: 1>} : vector<8x8xi32>
      %68 = arith.cmpi sle, %67, %66 : vector<8x8xi32>
      %69 = vector.extract_strided_slice %63 {offsets = [0, 0], sizes = [16, 8], strides = [1, 1]} : vector<16x32xf32> to vector<16x8xf32>
      %70 = vector.shape_cast %69 : vector<16x8xf32> to vector<2x8x8xf32>
      %71 = arith.truncf %70 : vector<2x8x8xf32> to vector<2x8x8xbf16>
      %72 = vector.extract_strided_slice %64 {offsets = [0, 0], sizes = [16, 8], strides = [1, 1]} : vector<16x32xf32> to vector<16x8xf32>
      %73 = vector.shape_cast %72 : vector<16x8xf32> to vector<2x8x8xf32>
      %74 = arith.truncf %73 : vector<2x8x8xf32> to vector<2x8x8xbf16>
      %75 = vector.extract_strided_slice %65 {offsets = [0, 0], sizes = [16, 8], strides = [1, 1]} : vector<16x32xf32> to vector<16x8xf32>
      %76 = vector.shape_cast %75 : vector<16x8xf32> to vector<2x8x8xf32>
      %77 = arith.truncf %76 : vector<2x8x8xf32> to vector<2x8x8xbf16>
      "tpu.trace_start"() <{level = 10 : i32, message = "bqd,bkd->bqk"}> : () -> ()
      %cst_35 = arith.constant dense<0.000000e+00> : vector<2x8x8xf32>
      %78 = tpu.matmul %71, %74, %cst_35 {dimension_numbers = #tpu.dot_dimension_numbers<[2], [2], [1], [1], [0, 0, 0, 1, 1, 1], [0], [0]>} : vector<2x8x8xbf16>, vector<2x8x8xbf16>, vector<2x8x8xf32> -> vector<2x8x8xf32>
      %cst_36 = arith.constant 0xFF800000 : f32
      "tpu.trace_stop"() : () -> ()
      %79 = vector.shape_cast %68 : vector<8x8xi1> to vector<1x8x8xi1>
      %80 = vector.broadcast %79 : vector<1x8x8xi1> to vector<2x8x8xi1>
      %81 = vector.broadcast %cst_36 : f32 to vector<2x8x8xf32>
      %82 = arith.select %80, %78, %81 : vector<2x8x8xi1>, vector<2x8x8xf32>
      %cst_37 = arith.constant dense<0xFF800000> : vector<2x8xf32>
      %83 = vector.multi_reduction <maximumf>, %82, %cst_37 [2] : vector<2x8x8xf32> to vector<2x8xf32>
      %84 = vector.shape_cast %83 : vector<2x8xf32> to vector<2x8x1xf32>
      %85 = vector.broadcast %84 : vector<2x8x1xf32> to vector<2x8x8xf32>
      %86 = arith.subf %82, %85 : vector<2x8x8xf32>
      %87 = math.exp %86 : vector<2x8x8xf32>
      %cst_38 = arith.constant dense<0.000000e+00> : vector<2x8xf32>
      %88 = vector.multi_reduction <add>, %87, %cst_38 [2] : vector<2x8x8xf32> to vector<2x8xf32>
      %89 = vector.shape_cast %88 : vector<2x8xf32> to vector<2x8x1xf32>
      %90 = tpu.reciprocal %89 {approx = true} : vector<2x8x1xf32> -> vector<2x8x1xf32>
      %91 = vector.broadcast %90 : vector<2x8x1xf32> to vector<2x8x8xf32>
      %92 = arith.mulf %87, %91 : vector<2x8x8xf32>
      %93 = arith.truncf %92 : vector<2x8x8xf32> to vector<2x8x8xbf16>
      "tpu.trace_start"() <{level = 10 : i32, message = "bqk,bkd->bqd"}> : () -> ()
      %cst_39 = arith.constant dense<0.000000e+00> : vector<2x8x8xf32>
      %94 = tpu.matmul %93, %77, %cst_39 {dimension_numbers = #tpu.dot_dimension_numbers<[2], [1], [1], [2], [0, 0, 0, 1, 1, 2], [0], [0]>} : vector<2x8x8xbf16>, vector<2x8x8xbf16>, vector<2x8x8xf32> -> vector<2x8x8xf32>
      "tpu.trace_stop"() : () -> ()
      %95 = vector.extract_strided_slice %63 {offsets = [0, 8], sizes = [16, 8], strides = [1, 1]} : vector<16x32xf32> to vector<16x8xf32>
      %96 = vector.shape_cast %95 : vector<16x8xf32> to vector<2x8x8xf32>
      %97 = arith.truncf %96 : vector<2x8x8xf32> to vector<2x8x8xbf16>
      %98 = vector.extract_strided_slice %64 {offsets = [0, 8], sizes = [16, 8], strides = [1, 1]} : vector<16x32xf32> to vector<16x8xf32>
      %99 = vector.shape_cast %98 : vector<16x8xf32> to vector<2x8x8xf32>
      %100 = arith.truncf %99 : vector<2x8x8xf32> to vector<2x8x8xbf16>
      %101 = vector.extract_strided_slice %65 {offsets = [0, 8], sizes = [16, 8], strides = [1, 1]} : vector<16x32xf32> to vector<16x8xf32>
      %102 = vector.shape_cast %101 : vector<16x8xf32> to vector<2x8x8xf32>
      %103 = arith.truncf %102 : vector<2x8x8xf32> to vector<2x8x8xbf16>
      "tpu.trace_start"() <{level = 10 : i32, message = "bqd,bkd->bqk"}> : () -> ()
      %cst_40 = arith.constant dense<0.000000e+00> : vector<2x8x8xf32>
      %104 = tpu.matmul %97, %100, %cst_40 {dimension_numbers = #tpu.dot_dimension_numbers<[2], [2], [1], [1], [0, 0, 0, 1, 1, 1], [0], [0]>} : vector<2x8x8xbf16>, vector<2x8x8xbf16>, vector<2x8x8xf32> -> vector<2x8x8xf32>
      %cst_41 = arith.constant 0xFF800000 : f32
      "tpu.trace_stop"() : () -> ()
      %105 = vector.shape_cast %68 : vector<8x8xi1> to vector<1x8x8xi1>
      %106 = vector.broadcast %105 : vector<1x8x8xi1> to vector<2x8x8xi1>
      %107 = vector.broadcast %cst_41 : f32 to vector<2x8x8xf32>
      %108 = arith.select %106, %104, %107 : vector<2x8x8xi1>, vector<2x8x8xf32>
      %cst_42 = arith.constant dense<0xFF800000> : vector<2x8xf32>
      %109 = vector.multi_reduction <maximumf>, %108, %cst_42 [2] : vector<2x8x8xf32> to vector<2x8xf32>
      %110 = vector.shape_cast %109 : vector<2x8xf32> to vector<2x8x1xf32>
      %111 = vector.broadcast %110 : vector<2x8x1xf32> to vector<2x8x8xf32>
      %112 = arith.subf %108, %111 : vector<2x8x8xf32>
      %113 = math.exp %112 : vector<2x8x8xf32>
      %cst_43 = arith.constant dense<0.000000e+00> : vector<2x8xf32>
      %114 = vector.multi_reduction <add>, %113, %cst_43 [2] : vector<2x8x8xf32> to vector<2x8xf32>
      %115 = vector.shape_cast %114 : vector<2x8xf32> to vector<2x8x1xf32>
      %116 = tpu.reciprocal %115 {approx = true} : vector<2x8x1xf32> -> vector<2x8x1xf32>
      %117 = vector.broadcast %116 : vector<2x8x1xf32> to vector<2x8x8xf32>
      %118 = arith.mulf %113, %117 : vector<2x8x8xf32>
      %119 = arith.truncf %118 : vector<2x8x8xf32> to vector<2x8x8xbf16>
      "tpu.trace_start"() <{level = 10 : i32, message = "bqk,bkd->bqd"}> : () -> ()
      %cst_44 = arith.constant dense<0.000000e+00> : vector<2x8x8xf32>
      %120 = tpu.matmul %119, %103, %cst_44 {dimension_numbers = #tpu.dot_dimension_numbers<[2], [1], [1], [2], [0, 0, 0, 1, 1, 2], [0], [0]>} : vector<2x8x8xbf16>, vector<2x8x8xbf16>, vector<2x8x8xf32> -> vector<2x8x8xf32>
      "tpu.trace_stop"() : () -> ()
      %121 = vector.extract_strided_slice %63 {offsets = [0, 16], sizes = [16, 8], strides = [1, 1]} : vector<16x32xf32> to vector<16x8xf32>
      %122 = vector.shape_cast %121 : vector<16x8xf32> to vector<2x8x8xf32>
      %123 = arith.truncf %122 : vector<2x8x8xf32> to vector<2x8x8xbf16>
      %124 = vector.extract_strided_slice %64 {offsets = [0, 16], sizes = [16, 8], strides = [1, 1]} : vector<16x32xf32> to vector<16x8xf32>
      %125 = vector.shape_cast %124 : vector<16x8xf32> to vector<2x8x8xf32>
      %126 = arith.truncf %125 : vector<2x8x8xf32> to vector<2x8x8xbf16>
      %127 = vector.extract_strided_slice %65 {offsets = [0, 16], sizes = [16, 8], strides = [1, 1]} : vector<16x32xf32> to vector<16x8xf32>
      %128 = vector.shape_cast %127 : vector<16x8xf32> to vector<2x8x8xf32>
      %129 = arith.truncf %128 : vector<2x8x8xf32> to vector<2x8x8xbf16>
      "tpu.trace_start"() <{level = 10 : i32, message = "bqd,bkd->bqk"}> : () -> ()
      %cst_45 = arith.constant dense<0.000000e+00> : vector<2x8x8xf32>
      %130 = tpu.matmul %123, %126, %cst_45 {dimension_numbers = #tpu.dot_dimension_numbers<[2], [2], [1], [1], [0, 0, 0, 1, 1, 1], [0], [0]>} : vector<2x8x8xbf16>, vector<2x8x8xbf16>, vector<2x8x8xf32> -> vector<2x8x8xf32>
      %cst_46 = arith.constant 0xFF800000 : f32
      "tpu.trace_stop"() : () -> ()
      %131 = vector.shape_cast %68 : vector<8x8xi1> to vector<1x8x8xi1>
      %132 = vector.broadcast %131 : vector<1x8x8xi1> to vector<2x8x8xi1>
      %133 = vector.broadcast %cst_46 : f32 to vector<2x8x8xf32>
      %134 = arith.select %132, %130, %133 : vector<2x8x8xi1>, vector<2x8x8xf32>
      %cst_47 = arith.constant dense<0xFF800000> : vector<2x8xf32>
      %135 = vector.multi_reduction <maximumf>, %134, %cst_47 [2] : vector<2x8x8xf32> to vector<2x8xf32>
      %136 = vector.shape_cast %135 : vector<2x8xf32> to vector<2x8x1xf32>
      %137 = vector.broadcast %136 : vector<2x8x1xf32> to vector<2x8x8xf32>
      %138 = arith.subf %134, %137 : vector<2x8x8xf32>
      %139 = math.exp %138 : vector<2x8x8xf32>
      %cst_48 = arith.constant dense<0.000000e+00> : vector<2x8xf32>
      %140 = vector.multi_reduction <add>, %139, %cst_48 [2] : vector<2x8x8xf32> to vector<2x8xf32>
      %141 = vector.shape_cast %140 : vector<2x8xf32> to vector<2x8x1xf32>
      %142 = tpu.reciprocal %141 {approx = true} : vector<2x8x1xf32> -> vector<2x8x1xf32>
      %143 = vector.broadcast %142 : vector<2x8x1xf32> to vector<2x8x8xf32>
      %144 = arith.mulf %139, %143 : vector<2x8x8xf32>
      %145 = arith.truncf %144 : vector<2x8x8xf32> to vector<2x8x8xbf16>
      "tpu.trace_start"() <{level = 10 : i32, message = "bqk,bkd->bqd"}> : () -> ()
      %cst_49 = arith.constant dense<0.000000e+00> : vector<2x8x8xf32>
      %146 = tpu.matmul %145, %129, %cst_49 {dimension_numbers = #tpu.dot_dimension_numbers<[2], [1], [1], [2], [0, 0, 0, 1, 1, 2], [0], [0]>} : vector<2x8x8xbf16>, vector<2x8x8xbf16>, vector<2x8x8xf32> -> vector<2x8x8xf32>
      "tpu.trace_stop"() : () -> ()
      %147 = vector.extract_strided_slice %63 {offsets = [0, 24], sizes = [16, 8], strides = [1, 1]} : vector<16x32xf32> to vector<16x8xf32>
      %148 = vector.shape_cast %147 : vector<16x8xf32> to vector<2x8x8xf32>
      %149 = arith.truncf %148 : vector<2x8x8xf32> to vector<2x8x8xbf16>
      %150 = vector.extract_strided_slice %64 {offsets = [0, 24], sizes = [16, 8], strides = [1, 1]} : vector<16x32xf32> to vector<16x8xf32>
      %151 = vector.shape_cast %150 : vector<16x8xf32> to vector<2x8x8xf32>
      %152 = arith.truncf %151 : vector<2x8x8xf32> to vector<2x8x8xbf16>
      %153 = vector.extract_strided_slice %65 {offsets = [0, 24], sizes = [16, 8], strides = [1, 1]} : vector<16x32xf32> to vector<16x8xf32>
      %154 = vector.shape_cast %153 : vector<16x8xf32> to vector<2x8x8xf32>
      %155 = arith.truncf %154 : vector<2x8x8xf32> to vector<2x8x8xbf16>
      "tpu.trace_start"() <{level = 10 : i32, message = "bqd,bkd->bqk"}> : () -> ()
      %cst_50 = arith.constant dense<0.000000e+00> : vector<2x8x8xf32>
      %156 = tpu.matmul %149, %152, %cst_50 {dimension_numbers = #tpu.dot_dimension_numbers<[2], [2], [1], [1], [0, 0, 0, 1, 1, 1], [0], [0]>} : vector<2x8x8xbf16>, vector<2x8x8xbf16>, vector<2x8x8xf32> -> vector<2x8x8xf32>
      %cst_51 = arith.constant 0xFF800000 : f32
      "tpu.trace_stop"() : () -> ()
      %157 = vector.shape_cast %68 : vector<8x8xi1> to vector<1x8x8xi1>
      %158 = vector.broadcast %157 : vector<1x8x8xi1> to vector<2x8x8xi1>
      %159 = vector.broadcast %cst_51 : f32 to vector<2x8x8xf32>
      %160 = arith.select %158, %156, %159 : vector<2x8x8xi1>, vector<2x8x8xf32>
      %cst_52 = arith.constant dense<0xFF800000> : vector<2x8xf32>
      %161 = vector.multi_reduction <maximumf>, %160, %cst_52 [2] : vector<2x8x8xf32> to vector<2x8xf32>
      %162 = vector.shape_cast %161 : vector<2x8xf32> to vector<2x8x1xf32>
      %163 = vector.broadcast %162 : vector<2x8x1xf32> to vector<2x8x8xf32>
      %164 = arith.subf %160, %163 : vector<2x8x8xf32>
      %165 = math.exp %164 : vector<2x8x8xf32>
      %cst_53 = arith.constant dense<0.000000e+00> : vector<2x8xf32>
      %166 = vector.multi_reduction <add>, %165, %cst_53 [2] : vector<2x8x8xf32> to vector<2x8xf32>
      %167 = vector.shape_cast %166 : vector<2x8xf32> to vector<2x8x1xf32>
      %168 = tpu.reciprocal %167 {approx = true} : vector<2x8x1xf32> -> vector<2x8x1xf32>
      %169 = vector.broadcast %168 : vector<2x8x1xf32> to vector<2x8x8xf32>
      %170 = arith.mulf %165, %169 : vector<2x8x8xf32>
      %171 = arith.truncf %170 : vector<2x8x8xf32> to vector<2x8x8xbf16>
      "tpu.trace_start"() <{level = 10 : i32, message = "bqk,bkd->bqd"}> : () -> ()
      %cst_54 = arith.constant dense<0.000000e+00> : vector<2x8x8xf32>
      %172 = tpu.matmul %171, %155, %cst_54 {dimension_numbers = #tpu.dot_dimension_numbers<[2], [1], [1], [2], [0, 0, 0, 1, 1, 2], [0], [0]>} : vector<2x8x8xbf16>, vector<2x8x8xbf16>, vector<2x8x8xf32> -> vector<2x8x8xf32>
      "tpu.trace_stop"() : () -> ()
      %173 = tpu.concatenate %94, %120, %146, %172 in 2 : vector<2x8x8xf32>, vector<2x8x8xf32>, vector<2x8x8xf32>, vector<2x8x8xf32> -> vector<2x8x32xf32>
      %174 = vector.shape_cast %173 : vector<2x8x32xf32> to vector<16x32xf32>
      %175 = arith.truncf %174 : vector<16x32xf32> to vector<16x32xbf16>
      %c0_55 = arith.constant 0 : index
      %c0_56 = arith.constant 0 : index
      %176 = vector.load %arg6[%c0_55, %c0_56] : memref<32x32xbf16, #tpu.memory_space<vmem>>, vector<32x32xbf16>
      %cst_57 = arith.constant dense<0.000000e+00> : vector<16x32xf32>
      %177 = tpu.matmul %175, %176, %cst_57 {dimension_numbers = #tpu.dot_dimension_numbers<[1], [0], [0], [1], [0, 0, 1, 1], [], []>} : vector<16x32xbf16>, vector<32x32xbf16>, vector<16x32xf32> -> vector<16x32xf32>
      %c0_58 = arith.constant 0 : index
      %c0_59 = arith.constant 0 : index
      %178 = vector.load %arg7[%c0_58, %c0_59] : memref<1x32xf32, #tpu.memory_space<vmem>>, vector<1x32xf32>
      %179 = vector.broadcast %178 : vector<1x32xf32> to vector<16x32xf32>
      %180 = arith.addf %177, %179 : vector<16x32xf32>
      %181 = arith.addf %33, %180 : vector<16x32xf32>
      %c0_60 = arith.constant 0 : index
      %c0_61 = arith.constant 0 : index
      %182 = vector.load %arg15[%c0_60, %c0_61] : memref<16x32xf32, #tpu.memory_space<vmem>>, vector<16x32xf32>
      tpu.vector_store %arg15[%c0_60, %c0_61], %181 {strides = array<i32>} : memref<16x32xf32, #tpu.memory_space<vmem>>, vector<16x32xf32>,
      %c0_62 = arith.constant 0 : index
      %c0_63 = arith.constant 0 : index
      %183 = vector.load %arg8[%c0_62, %c0_63] : memref<1x32xf32, #tpu.memory_space<vmem>>, vector<1x32xf32>
      %c0_64 = arith.constant 0 : index
      %c0_65 = arith.constant 0 : index
      %184 = vector.load %arg9[%c0_64, %c0_65] : memref<1x32xf32, #tpu.memory_space<vmem>>, vector<1x32xf32>
      %cst_66 = arith.constant dense<0.000000e+00> : vector<16xf32>
      %185 = vector.multi_reduction <add>, %181, %cst_66 [1] : vector<16x32xf32> to vector<16xf32>
      %186 = vector.shape_cast %185 : vector<16xf32> to vector<16x1xf32>
      %cst_67 = arith.constant 3.200000e+01 : f32
      %187 = vector.broadcast %cst_67 : f32 to vector<16x1xf32>
      %188 = arith.divf %186, %187 : vector<16x1xf32>
      %189 = vector.broadcast %188 : vector<16x1xf32> to vector<16x32xf32>
      %190 = arith.subf %181, %189 : vector<16x32xf32>
      %191 = arith.mulf %190, %190 : vector<16x32xf32>
      %cst_68 = arith.constant dense<0.000000e+00> : vector<16xf32>
      %192 = vector.multi_reduction <add>, %191, %cst_68 [1] : vector<16x32xf32> to vector<16xf32>
      %193 = vector.shape_cast %192 : vector<16xf32> to vector<16x1xf32>
      %cst_69 = arith.constant 3.200000e+01 : f32
      %194 = vector.broadcast %cst_69 : f32 to vector<16x1xf32>
      %195 = arith.divf %193, %194 : vector<16x1xf32>
      %196 = vector.broadcast %188 : vector<16x1xf32> to vector<16x32xf32>
      %197 = arith.subf %181, %196 : vector<16x32xf32>
      %cst_70 = arith.constant 9.99999974E-6 : f32
      %198 = vector.broadcast %cst_70 : f32 to vector<16x1xf32>
      %199 = arith.addf %195, %198 : vector<16x1xf32>
      %200 = math.sqrt %199 : vector<16x1xf32>
      %201 = vector.broadcast %200 : vector<16x1xf32> to vector<16x32xf32>
      %202 = arith.divf %197, %201 : vector<16x32xf32>
      %203 = vector.broadcast %183 : vector<1x32xf32> to vector<16x32xf32>
      %204 = arith.mulf %203, %202 : vector<16x32xf32>
      %205 = vector.broadcast %184 : vector<1x32xf32> to vector<16x32xf32>
      %206 = arith.addf %204, %205 : vector<16x32xf32>
      %207 = arith.truncf %206 : vector<16x32xf32> to vector<16x32xbf16>
      %c0_71 = arith.constant 0 : index
      %c0_72 = arith.constant 0 : index
      %208 = vector.load %arg16[%c0_71, %c0_72] : memref<16x32xbf16, #tpu.memory_space<vmem>>, vector<16x32xbf16>
      tpu.vector_store %arg16[%c0_71, %c0_72], %207 {strides = array<i32>} : memref<16x32xbf16, #tpu.memory_space<vmem>>, vector<16x32xbf16>,
      %cst_73 = arith.constant 0.000000e+00 : f32
      %209 = vector.broadcast %cst_73 : f32 to vector<16x32xf32>
      %c0_74 = arith.constant 0 : index
      %c0_75 = arith.constant 0 : index
      %210 = vector.load %arg17[%c0_74, %c0_75] : memref<16x32xf32, #tpu.memory_space<vmem>>, vector<16x32xf32>
      tpu.vector_store %arg17[%c0_74, %c0_75], %209 {strides = array<i32>} : memref<16x32xf32, #tpu.memory_space<vmem>>, vector<16x32xf32>,
    } else {
    }
    %c0 = arith.constant 0 : index
    %c0_1 = arith.constant 0 : index
    %3 = vector.load %arg16[%c0, %c0_1] : memref<16x32xbf16, #tpu.memory_space<vmem>>, vector<16x32xbf16>
    %c0_2 = arith.constant 0 : index
    %c0_3 = arith.constant 0 : index
    %4 = vector.load %arg10[%c0_2, %c0_3] : memref<32x128xbf16, #tpu.memory_space<vmem>>, vector<32x128xbf16>
    %cst = arith.constant dense<0.000000e+00> : vector<16x128xf32>
    %5 = tpu.matmul %3, %4, %cst {dimension_numbers = #tpu.dot_dimension_numbers<[1], [0], [0], [1], [0, 0, 1, 1], [], []>} : vector<16x32xbf16>, vector<32x128xbf16>, vector<16x128xf32> -> vector<16x128xf32>
    %c0_4 = arith.constant 0 : index
    %c0_5 = arith.constant 0 : index
    %6 = vector.load %arg11[%c0_4, %c0_5] : memref<1x128xf32, #tpu.memory_space<vmem>>, vector<1x128xf32>
    %7 = vector.broadcast %6 : vector<1x128xf32> to vector<16x128xf32>
    %8 = arith.addf %5, %7 : vector<16x128xf32>
    %cst_6 = arith.constant 0.636619746 : f32
    %9 = math.sqrt %cst_6 : f32
    %cst_7 = arith.constant 5.000000e-01 : f32
    %10 = vector.broadcast %cst_7 : f32 to vector<16x128xf32>
    %11 = arith.mulf %10, %8 : vector<16x128xf32>
    %12 = arith.mulf %8, %8 : vector<16x128xf32>
    %13 = arith.mulf %8, %12 : vector<16x128xf32>
    %cst_8 = arith.constant 4.471500e-02 : f32
    %14 = vector.broadcast %cst_8 : f32 to vector<16x128xf32>
    %15 = arith.mulf %14, %13 : vector<16x128xf32>
    %16 = arith.addf %8, %15 : vector<16x128xf32>
    %17 = vector.broadcast %9 : f32 to vector<16x128xf32>
    %18 = arith.mulf %17, %16 : vector<16x128xf32>
    %19 = math.tanh %18 : vector<16x128xf32>
    %cst_9 = arith.constant 1.000000e+00 : f32
    %20 = vector.broadcast %cst_9 : f32 to vector<16x128xf32>
    %21 = arith.addf %20, %19 : vector<16x128xf32>
    %22 = arith.mulf %11, %21 : vector<16x128xf32>
    %c0_10 = arith.constant 0 : index
    %c0_11 = arith.constant 0 : index
    %23 = vector.load %arg17[%c0_10, %c0_11] : memref<16x32xf32, #tpu.memory_space<vmem>>, vector<16x32xf32>
    %24 = arith.truncf %22 : vector<16x128xf32> to vector<16x128xbf16>
    %c0_12 = arith.constant 0 : index
    %c0_13 = arith.constant 0 : index
    %25 = vector.load %arg12[%c0_12, %c0_13] : memref<128x32xbf16, #tpu.memory_space<vmem>>, vector<128x32xbf16>
    %cst_14 = arith.constant dense<0.000000e+00> : vector<16x32xf32>
    %26 = tpu.matmul %24, %25, %cst_14 {dimension_numbers = #tpu.dot_dimension_numbers<[1], [0], [0], [1], [0, 0, 1, 1], [], []>} : vector<16x128xbf16>, vector<128x32xbf16>, vector<16x32xf32> -> vector<16x32xf32>
    %27 = arith.addf %23, %26 : vector<16x32xf32>
    %c0_15 = arith.constant 0 : index
    %c0_16 = arith.constant 0 : index
    %28 = vector.load %arg17[%c0_15, %c0_16] : memref<16x32xf32, #tpu.memory_space<vmem>>, vector<16x32xf32>
    tpu.vector_store %arg17[%c0_15, %c0_16], %27 {strides = array<i32>} : memref<16x32xf32, #tpu.memory_space<vmem>>, vector<16x32xf32>,
    %c0_i32_17 = arith.constant 0 : i32
    %29 = arith.cmpi eq, %arg1, %c0_i32_17 : i32
    %30 = arith.extui %29 : i1 to i32
    %c0_i32_18 = arith.constant 0 : i32
    %31 = arith.cmpi ne, %30, %c0_i32_18 : i32
    scf.if %31 {
      %c0_19 = arith.constant 0 : index
      %c0_20 = arith.constant 0 : index
      %32 = vector.load %arg15[%c0_19, %c0_20] : memref<16x32xf32, #tpu.memory_space<vmem>>, vector<16x32xf32>
      %c0_21 = arith.constant 0 : index
      %c0_22 = arith.constant 0 : index
      %33 = vector.load %arg17[%c0_21, %c0_22] : memref<16x32xf32, #tpu.memory_space<vmem>>, vector<16x32xf32>
      %34 = arith.addf %32, %33 : vector<16x32xf32>
      %c0_23 = arith.constant 0 : index
      %c0_24 = arith.constant 0 : index
      %35 = vector.load %arg13[%c0_23, %c0_24] : memref<1x32xf32, #tpu.memory_space<vmem>>, vector<1x32xf32>
      %36 = vector.broadcast %35 : vector<1x32xf32> to vector<16x32xf32>
      %37 = arith.addf %34, %36 : vector<16x32xf32>
      %38 = vector.shape_cast %37 : vector<16x32xf32> to vector<2x8x32xf32>
      %c0_25 = arith.constant 0 : index
      %c0_26 = arith.constant 0 : index
      %c0_27 = arith.constant 0 : index
      %39 = vector.load %arg14[%c0_25, %c0_26, %c0_27] : memref<2x8x32xf32, #tpu.memory_space<vmem>>, vector<2x8x32xf32>
      tpu.vector_store %arg14[%c0_25, %c0_26, %c0_27], %38 {strides = array<i32>} : memref<2x8x32xf32, #tpu.memory_space<vmem>>, vector<2x8x32xf32>,
    } else {
    }
    return
  }
  func.func @transform_0(%arg0: i32, %arg1: i32) -> (i32, i32, i32) {
    %c0_i32 = arith.constant 0 : i32
    %c0_i32_0 = arith.constant 0 : i32
    %c0_i32_1 = arith.constant 0 : i32
    return %arg0, %c0_i32, %c0_i32_0 : i32, i32, i32
  }
  func.func @transform_1(%arg0: i32, %arg1: i32) -> (i32, i32) {
    %c0_i32 = arith.constant 0 : i32
    %c0_i32_0 = arith.constant 0 : i32
    %c0_i32_1 = arith.constant 0 : i32
    return %c0_i32, %c0_i32_0 : i32, i32
  }
  func.func @transform_2(%arg0: i32, %arg1: i32) -> (i32, i32) {
    %c0_i32 = arith.constant 0 : i32
    %c0_i32_0 = arith.constant 0 : i32
    %c0_i32_1 = arith.constant 0 : i32
    return %c0_i32, %c0_i32_0 : i32, i32
  }
  func.func @transform_3(%arg0: i32, %arg1: i32) -> (i32, i32) {
    %c0_i32 = arith.constant 0 : i32
    %c0_i32_0 = arith.constant 0 : i32
    %c0_i32_1 = arith.constant 0 : i32
    return %c0_i32, %c0_i32_0 : i32, i32
  }
  func.func @transform_4(%arg0: i32, %arg1: i32) -> (i32, i32) {
    %c0_i32 = arith.constant 0 : i32
    %c0_i32_0 = arith.constant 0 : i32
    %c0_i32_1 = arith.constant 0 : i32
    return %c0_i32, %c0_i32_0 : i32, i32
  }
  func.func @transform_5(%arg0: i32, %arg1: i32) -> (i32, i32) {
    %c0_i32 = arith.constant 0 : i32
    %c0_i32_0 = arith.constant 0 : i32
    %c0_i32_1 = arith.constant 0 : i32
    return %c0_i32, %c0_i32_0 : i32, i32
  }
  func.func @transform_6(%arg0: i32, %arg1: i32) -> (i32, i32) {
    %c0_i32 = arith.constant 0 : i32
    %c0_i32_0 = arith.constant 0 : i32
    %c0_i32_1 = arith.constant 0 : i32
    return %c0_i32, %c0_i32_0 : i32, i32
  }
  func.func @transform_7(%arg0: i32, %arg1: i32) -> (i32, i32) {
    %c0_i32 = arith.constant 0 : i32
    %c0_i32_0 = arith.constant 0 : i32
    %c0_i32_1 = arith.constant 0 : i32
    return %c0_i32, %c0_i32_0 : i32, i32
  }
  func.func @transform_8(%arg0: i32, %arg1: i32) -> (i32, i32) {
    %c0_i32 = arith.constant 0 : i32
    %c0_i32_0 = arith.constant 0 : i32
    return %c0_i32, %arg1 : i32, i32
  }
  func.func @transform_9(%arg0: i32, %arg1: i32) -> (i32, i32) {
    %c0_i32 = arith.constant 0 : i32
    %c0_i32_0 = arith.constant 0 : i32
    return %c0_i32, %arg1 : i32, i32
  }
  func.func @transform_10(%arg0: i32, %arg1: i32) -> (i32, i32) {
    %c0_i32 = arith.constant 0 : i32
    %c0_i32_0 = arith.constant 0 : i32
    return %arg1, %c0_i32 : i32, i32
  }
  func.func @transform_11(%arg0: i32, %arg1: i32) -> (i32, i32) {
    %c0_i32 = arith.constant 0 : i32
    %c0_i32_0 = arith.constant 0 : i32
    %c0_i32_1 = arith.constant 0 : i32
    return %c0_i32, %c0_i32_0 : i32, i32
  }
  func.func @transform_12(%arg0: i32, %arg1: i32) -> (i32, i32, i32) {
    %c0_i32 = arith.constant 0 : i32
    %c0_i32_0 = arith.constant 0 : i32
    %c0_i32_1 = arith.constant 0 : i32
    return %arg0, %c0_i32, %c0_i32_0 : i32, i32, i32
  }
}

</mosaic_0001>

<bundles_post_ra>
// kernel: tpu_custom_call.1
= control target key start
LH: loop header
LB: loop body
LE: loop exit
PB: predicated region body
PF: predicated region fallthrough
CT: control target
= control target key end

     0   :  { %vm51_vm0 = vcmask 261120   ;;  %s1560_s0 = inlined_call_operand.vmem [shape: f32[2,8,32], index: 0, kind: input, shape index: {}]   ;;  %s1561_s1 = inlined_call_operand.vmem [shape: f32[1,32], index: 1, kind: input, shape index: {}]   ;;  %s1562_s2 = inlined_call_operand.vmem [shape: f32[1,32], index: 2, kind: input, shape index: {}]   ;;  %s1563_s3 = inlined_call_operand.vmem [shape: bf16[32,96], index: 3, kind: input, shape index: {}]   ;;  %s1564_s4 = inlined_call_operand.vmem [shape: bf16[32,32], index: 4, kind: input, shape index: {}]   ;;  %s1565_s5 = inlined_call_operand.vmem [shape: f32[1,32], index: 5, kind: input, shape index: {}]   ;;  %s1566_s6 = inlined_call_operand.vmem [shape: f32[1,32], index: 6, kind: input, shape index: {}]   ;;  %s1567_s7 = inlined_call_operand.vmem [shape: f32[1,32], index: 7, kind: input, shape index: {}]   ;;  %s1568_s8 = inlined_call_operand.vmem [shape: bf16[32,128], index: 8, kind: input, shape index: {}]   ;;  %s1569_s9 = inlined_call_operand.vmem [shape: f32[1,128], index: 9, kind: input, shape index: {}]   ;;  %s1570_s10 = inlined_call_operand.vmem [shape: bf16[128,32], index: 10, kind: input, shape index: {}]   ;;  %s1571_s11 = inlined_call_operand.vmem [shape: f32[1,32], index: 11, kind: input, shape index: {}]   ;;  %s1572_s12 = inlined_call_operand.hbm [shape: f32[2,8,32], index: 12, kind: output, shape index: {}]  }
   0x1   :  { %v1310_v0 = vld [vmem:[%s1560_s0] sm:$0xff] }
   0x2   :  { %v52_v1 = vsel %vm51_vm0, %v1310_v0, 0.0 }
   0x3   :  { %53 = vadd.xlane.f32.xlu0 %v52_v1 }
   0x4   :  { %17 = vsyncpa [#allocation6], 0  ;;  %v1317_v2 = vld [vmem:[%s1560_s0 + $0x8] sm:$0xff]  ;;  %v1224_v4 = vmov 32.0   ;;  %v1089_v23 = vld [vmem:[%s1563_s3] sm:$0xff]  ;;  %s1226_s13 = smov 96  }
   0x5   :  { %v55_v3 = vsel %vm51_vm0, %v1317_v2, 0.0  ;;  %1144 = vrcp.f32 %v1224_v4  ;;  %v1090_v21 = vld [vmem:[%s1563_s3 + $0x8] sm:$0xff]  ;;  %s1228_s14 = smov 80   ;;  %s1229_s15 = smov 112   ;;  %vm195_vm14 = vcmask 64512   ;;  %vm272_vm15 = vcmask 1043456  }
   0x6   :  { %171 = vmatpush.bf16.msra.mxu0 %v1090_v21  ;;  %s1230_s16 = smov 72   ;;  %s1231_s17 = smov 104  }
   0x7   :  { %s1232_s18 = smov 64   ;;  %s1233_s19 = smov 48  }
   0x8   :  { %s1234_s20 = smov 56   ;;  %s1235_s21 = smov 40  }
   0x9   :  { %s1236_s22 = smov 8   ;;  %s1237_s23 = smov 16  }
   0xa   :  { %172 = vmatpush.bf16.msra.mxu0 %v1089_v23  ;;  %s1238_s24 = smov 24  }
   0xb   :  { %56 = vadd.xlane.f32.xlu0 %v55_v3  ;;  %v1145_v5 = vpop.eup %1144 }
   0xc   :  { %v59_v6 = vmul.f32 32.0, %v1145_v5  ;;  %vm63_vm1 = vweird.f32 %v1145_v5 }
   0xe   :  { %v60_v7 = vsub.f32 1.0, %v59_v6 }
  0x10   :  { %v61_v8 = vmul.f32 %v1145_v5, %v60_v7 }
  0x12   :  { %v62_v9 = vadd.f32 %v1145_v5, %v61_v8 }
  0x14   :  { %v1321_v10 = vsel %vm63_vm1, %v1145_v5, %v62_v9  ;;  %v1137_v5 = vld [vmem:[%s1561_s1] ss:$0 sm:$0xff]  ;;  %s1225_s1 = smov 88  }
  0x76   :  { %v54_v11 = vpop.xlane.xlu0 %53 }
  0x77   :  { %v65_v12 = vmul.f32 %v1321_v10, %v54_v11 }
  0x79   :  { %v1325_v13 = vsub.f32 %v1310_v0, %v65_v12  ;;  %v1138_v12 = vld [vmem:[%s1562_s2] ss:$0 sm:$0xff]  ;;  %s1227_s2 = smov 120  }
  0x7b   :  { %v69_v14 = vmul.f32 %v1325_v13, %v1325_v13 }
  0x7d   :  { %v71_v15 = vsel %vm51_vm0, %v69_v14, 0.0 }
  0x7e   :  { %72 = vadd.xlane.f32.xlu1 %v71_v15  ;;  %v57_v16 = vpop.xlane.xlu0 %56 }
  0x7f   :  { %v66_v17 = vmul.f32 %v1321_v10, %v57_v16 }
  0x81   :  { %v1332_v18 = vsub.f32 %v1317_v2, %v66_v17 }
  0x83   :  { %v70_v19 = vmul.f32 %v1332_v18, %v1332_v18 }
  0x85   :  { %v74_v20 = vsel %vm51_vm0, %v70_v19, 0.0 }
  0x86   :  { %75 = vadd.xlane.f32.xlu1 %v74_v20 }
  0xf1   :  { %v73_v22 = vpop.xlane.xlu1 %72 }
  0xf2   :  { %v77_v24 = vmul.f32 %v73_v22, %v1321_v10 }
  0xf4   :  { %v79_v25 = vadd.f32 1e-05, %v77_v24 }
  0xf6   :  { %1146 = vrsqrt.f32 %v79_v25  ;;  %vm88_vm2 = vcmp.eq.f32.partialorder %v79_v25, inf  ;;  %v91_v39 = vand.u32 2147483648, %v79_v25  ;;  %vm90_vm3 = vcmp.eq.f32.partialorder %v79_v25, 0.0 }
  0xf9   :  { %v76_v26 = vpop.xlane.xlu1 %75 }
  0xfa   :  { %v78_v27 = vmul.f32 %v76_v26, %v1321_v10 }
  0xfc   :  { %v1147_v28 = vpop.eup %1146  ;;  %v80_v29 = vadd.f32 1e-05, %v78_v27 }
  0xfd   :  { %v82_v30 = vmul.f32 %v1147_v28, %v79_v25 }
  0xfe   :  { %1148 = vrsqrt.f32 %v80_v29  ;;  %vm100_vm4 = vcmp.eq.f32.partialorder %v80_v29, inf  ;;  %v103_v46 = vand.u32 2147483648, %v80_v29  ;;  %vm102_vm5 = vcmp.eq.f32.partialorder %v80_v29, 0.0 }
  0xff   :  { %v83_v31 = vmul.f32 %v1147_v28, %v82_v30 }
 0x101   :  { %v84_v32 = vmul.f32 0.5, %v83_v31 }
 0x103   :  { %v85_v33 = vsub.f32 1.5, %v84_v32 }
 0x104   :  { %v1149_v34 = vpop.eup %1148 }
 0x105   :  { %v86_v35 = vmul.f32 %v1147_v28, %v85_v33  ;;  %v94_v36 = vmul.f32 %v1149_v34, %v80_v29 }
 0x107   :  { %v87_v37 = vmul.f32 %v86_v35, %v79_v25  ;;  %v95_v38 = vmul.f32 %v1149_v34, %v94_v36 }
 0x109   :  { %v96_v40 = vmul.f32 0.5, %v95_v38  ;;  %v89_v41 = vsel %vm88_vm2, %v79_v25, %v87_v37  ;;  %vm684_vm2 = vcmask 130048  }
 0x10a   :  { %v92_v42 = vsel %vm90_vm3, %v91_v39, %v89_v41  ;;  %vm687_vm3 = vcmask 195584  }
 0x10b   :  { %v97_v43 = vsub.f32 1.5, %v96_v40  ;;  %1150 = vrcp.f32 %v92_v42  ;;  %v116_v53 = vand.u32 2147483648, %v92_v42  ;;  %vm110_vm7 = vweird.f32 %v92_v42 }
 0x10c   :  { %v114_v55 = vand.u32 2147483647, %v92_v42 }
 0x10d   :  { %v98_v44 = vmul.f32 %v1149_v34, %v97_v43  ;;  %v117_v59 = vor.u32 1.1754944e-38, %v116_v53 }
 0x10e   :  { %vm115_vm9 = vcmp.eq.f32.partialorder %v114_v55, 8.507059e+37 }
 0x10f   :  { %v99_v45 = vmul.f32 %v98_v44, %v80_v29 }
 0x111   :  { %v1151_v47 = vpop.eup %1150  ;;  %v101_v48 = vsel %vm100_vm4, %v80_v29, %v99_v45 }
 0x112   :  { %v104_v49 = vsel %vm102_vm5, %v103_v46, %v101_v48  ;;  %v106_v50 = vmul.f32 %v1151_v47, %v92_v42  ;;  %vm111_vm6 = vweird.f32 %v1151_v47 }
 0x113   :  { %1152 = vrcp.f32 %v104_v49  ;;  %vm112_vm8 = vmor %vm110_vm7, %vm111_vm6  ;;  %v131_v62 = vand.u32 2147483648, %v104_v49  ;;  %v129_v1 = vand.u32 2147483647, %v104_v49  ;;  %vm125_vm11 = vweird.f32 %v104_v49 }
 0x114   :  { %v107_v51 = vsub.f32 1.0, %v106_v50 }
 0x115   :  { %v132_v6 = vor.u32 1.1754944e-38, %v131_v62  ;;  %vm130_vm13 = vcmp.eq.f32.partialorder %v129_v1, 8.507059e+37 }
 0x116   :  { %v108_v52 = vmul.f32 %v1151_v47, %v107_v51 }
 0x118   :  { %v109_v54 = vadd.f32 %v1151_v47, %v108_v52 }
 0x119   :  { %v1153_v56 = vpop.eup %1152 }
 0x11a   :  { %v113_v57 = vsel %vm112_vm8, %v1151_v47, %v109_v54  ;;  %v121_v58 = vmul.f32 %v1153_v56, %v104_v49  ;;  %vm126_vm10 = vweird.f32 %v1153_v56 }
 0x11b   :  { %v118_v61 = vsel %vm115_vm9, %v117_v59, %v113_v57  ;;  %vm127_vm12 = vmor %vm125_vm11, %vm126_vm10  ;;  %v181_v57 = vlaneseq }
 0x11c   :  { %v122_v60 = vsub.f32 1.0, %v121_v58  ;;  %v119_v3 = vmul.f32 %v118_v61, %v1325_v13 }
 0x11d   :  { %v182_v58 = vshrl.u32 %v181_v57, 7  ;;  %v184_v59 = vand.u32 127, %v181_v57 }
 0x11e   :  { %v123_v63 = vmul.f32 %v1153_v56, %v122_v60  ;;  %v138_v11 = vmul.f32 %v1137_v5, %v119_v3 }
 0x11f   :  { %vm1385_vm1 = vcmp.le.s32.totalorder %v184_v59, %v182_v58 }
 0x120   :  { %v124_v4 = vadd.f32 %v1153_v56, %v123_v63  ;;  %v143_v13 = vadd.f32 %v1138_v12, %v138_v11 }
 0x122   :  { %v128_v7 = vsel %vm127_vm12, %v1153_v56, %v124_v4 }
 0x123   :  { %v133_v8 = vsel %vm130_vm13, %v132_v6, %v128_v7  ;;  %vm822_vm13 = vcmask 257024  }
 0x124   :  { %v134_v9 = vmul.f32 %v133_v8, %v1332_v18 }
 0x126   :  { %v139_v14 = vmul.f32 %v1137_v5, %v134_v9 }
 0x128   :  { %v144_v15 = vadd.f32 %v1138_v12, %v139_v14 }
 0x12a   :  { %v145_v16 = vpack.c.bf16 %v144_v15, %v143_v13 }
 0x12c   :  { %1018 = vmatmul.msk.bf16.vlgmr.msra.gmra.mxu0 %vm51_vm0, %v145_v16 }
 0x1a9   :  { %v174_v17 = vpop.f32.mrf.mxu0 }
 0x1aa   :  { %v179_v19 = vmul.f32 0.35355338, %v174_v17  ;;  %v188_v20 = vpack.c.bf16 %v174_v17, %v174_v17 }
 0x1ac   :  { %v186_v21 = vpack.c.bf16 %v179_v19, %v179_v19  ;;  %v191_v22 = vunpack.c.l.b16 %v188_v20 }
 0x1ae   :  { %v1354_v23 = vpack.c.b16 %v191_v22, %v191_v22  ;;  %v311_v24 = vunpack.c.l.b16 %v186_v21 }
 0x1b0   :  { %315 = vrot.lane.b32.xlu0 %v1354_v23, %s1225_s1  ;;  %193 = vrot.lane.b32.xlu2 %v1354_v23, %s1226_s13  ;;  %v312_v18 = vpack.c.b16 %v311_v24, %v311_v24 }
 0x1b1   :  { %v176_v25 = vpop.f32.mrf.mxu0 }
 0x1b2   :  { %v180_v26 = vmul.f32 0.35355338, %v176_v25  ;;  %v189_v27 = vpack.c.bf16 %v176_v25, %v176_v25  ;;  %313 = vrot.lane.b32.xlu1 %v312_v18, %s1227_s2 }
 0x1b4   :  { %v187_v28 = vpack.c.bf16 %v180_v26, %v180_v26  ;;  %v216_v29 = vunpack.c.l.b16 %v189_v27 }
 0x1b6   :  { %v1358_v30 = vpack.c.b16 %v216_v29, %v216_v29  ;;  %v337_v31 = vunpack.c.l.b16 %v187_v28 }
 0x1b8   :  { %455 = vrot.lane.b32.xlu0 %v1358_v30, %s1228_s14  ;;  %218 = vrot.lane.b32.xlu2 %v1358_v30, %s1226_s13  ;;  %v338_v32 = vpack.c.b16 %v337_v31, %v337_v31 }
 0x1ba   :  { %453 = vrot.lane.b32.xlu1 %v338_v32, %s1229_s15 }
 0x1c0   :  { %546 = vrot.lane.b32.xlu0 %v1354_v23, %s1230_s16  ;;  %341 = vrot.lane.b32.xlu2 %v1358_v30, %s1225_s1 }
 0x1c2   :  { %544 = vrot.lane.b32.xlu1 %v312_v18, %s1231_s17 }
 0x1c8   :  { %567 = vrot.lane.b32.xlu0 %v338_v32, %s1231_s17  ;;  %339 = vrot.lane.b32.xlu2 %v338_v32, %s1227_s2 }
 0x1d0   :  { %267 = vrot.lane.b32.xlu0 %v1354_v23, %s1232_s18  ;;  %432 = vrot.lane.b32.xlu2 %v1354_v23, %s1228_s14 }
 0x1d8   :  { %430 = vrot.lane.b32.xlu2 %v312_v18, %s1229_s15 }
 0x1e0   :  { %569 = vrot.lane.b32.xlu2 %v1358_v30, %s1230_s16 }
 0x20a   :  { %v194_v33 = vpop.permute.xlu2 %193 }
 0x20b   :  { %v200_v34 = vsel %vm195_vm14, %v194_v33, 0 }
 0x20c   :  { %209 = vmatpush.bf16.xpose.msra.mxu1 %v200_v34 }
 0x212   :  { %v219_v35 = vpop.permute.xlu2 %218 }
 0x213   :  { %1019 = vmatmul.msk.bf16.vlgmr.msra.gmra.mxu1 %vm195_vm14, %v186_v21  ;;  %v224_v36 = vsel %vm195_vm14, %v219_v35, 0 }
 0x214   :  { %233 = vmatpush.bf16.xpose.msra.mxu2 %v224_v36 }
 0x21a   :  { %v342_v37 = vpop.permute.xlu2 %341 }
 0x21b   :  { %1020 = vmatmul.msk.bf16.vlgmr.msra.gmra.mxu2 %vm195_vm14, %v187_v28  ;;  %v347_v38 = vsel %vm195_vm14, %v342_v37, 0 }
 0x21c   :  { %356 = vmatpush.bf16.xpose.msrb.mxu1 %v347_v38 }
 0x222   :  { %v316_v39 = vpop.permute.xlu0 %315  ;;  %v340_v40 = vpop.permute.xlu2 %339 }
 0x223   :  { %1024 = vmatmul.msk.bf16.vlgmr.msrb.gmra.mxu1 %vm195_vm14, %v340_v40  ;;  %v321_v41 = vsel %vm195_vm14, %v316_v39, 0 }
 0x224   :  { %330 = vmatpush.bf16.xpose.msrb.mxu0 %v321_v41  ;;  %v314_v42 = vpop.permute.xlu1 %313 }
 0x22a   :  { %v456_v43 = vpop.permute.xlu0 %455  ;;  %v433_v44 = vpop.permute.xlu2 %432 }
 0x22b   :  { %v461_v45 = vsel %vm195_vm14, %v456_v43, 0  ;;  %v438_v46 = vsel %vm195_vm14, %v433_v44, 0  ;;  %1023 = vmatmul.msk.bf16.vlgmr.msrb.gmra.mxu0 %vm195_vm14, %v314_v42 }
 0x22c   :  { %470 = vmatpush.bf16.xpose.msra.mxu1 %v461_v45  ;;  %447 = vmatpush.bf16.xpose.msra.mxu0 %v438_v46  ;;  %v454_v47 = vpop.permute.xlu1 %453 }
 0x232   :  { %v547_v48 = vpop.permute.xlu0 %546  ;;  %v431_v49 = vpop.permute.xlu2 %430 }
 0x233   :  { %v552_v50 = vsel %vm195_vm14, %v547_v48, 0  ;;  %1028 = vmatmul.msk.bf16.vlgmr.msra.gmra.mxu1 %vm195_vm14, %v454_v47 }
 0x234   :  { %561 = vmatpush.bf16.xpose.msrb.mxu0 %v552_v50  ;;  %v545_v56 = vpop.permute.xlu1 %544 }
 0x23a   :  { %v568_v51 = vpop.permute.xlu0 %567  ;;  %v570_v52 = vpop.permute.xlu2 %569 }
 0x23b   :  { %v575_v53 = vsel %vm195_vm14, %v570_v52, 0  ;;  %1027 = vmatmul.msk.bf16.vlgmr.msra.gmra.mxu0 %vm195_vm14, %v431_v49 }
 0x23c   :  { %584 = vmatpush.bf16.xpose.msrb.mxu1 %v575_v53 }
 0x242   :  { %v268_v54 = vpop.permute.xlu0 %267 }
 0x243   :  { %1032 = vmatmul.msk.bf16.vlgmr.msrb.gmra.mxu1 %vm195_vm14, %v568_v51  ;;  %v274_v55 = vsel %vm272_vm15, %v268_v54, 0 }
 0x244   :  { %283 = vmatpush.bf16.msra.mxu3 %v274_v55 }
 0x24b   :  { %1031 = vmatmul.msk.bf16.vlgmr.msrb.gmra.mxu0 %vm195_vm14, %v545_v56 }
 0x290   :  { %v211_v61 = vpop.f32.mrf.mxu1 }
 0x291   :  { %v241_v62 = vsel %vm1385_vm1, %v211_v61, -inf }
 0x292   :  { %v243_v63 = vsel %vm195_vm14, %v241_v62, -inf }
 0x293   :  { %244 = vmax.xlane.f32.xlu2 %v243_v63 }
 0x298   :  { %v213_v1 = vpop.f32.mrf.mxu1 }
 0x29e   :  { %v235_v3 = vpop.f32.mrf.mxu2 }
 0x29f   :  { %v242_v4 = vsel %vm1385_vm1, %v235_v3, -inf }
 0x2a0   :  { %v358_v5 = vpop.f32.mrf.mxu1  ;;  %v246_v6 = vsel %vm195_vm14, %v242_v4, -inf }
 0x2a1   :  { %v1397_v7 = vsel %vm1385_vm1, %v358_v5, -inf  ;;  %247 = vmax.xlane.f32.xlu1 %v246_v6 }
 0x2a2   :  { %v367_v8 = vsel %vm195_vm14, %v1397_v7, -inf }
 0x2a3   :  { %368 = vmax.xlane.f32.xlu2 %v367_v8 }
 0x2a6   :  { %v237_v9 = vpop.f32.mrf.mxu2 }
 0x2a8   :  { %v332_v11 = vpop.f32.mrf.mxu0  ;;  %v360_v12 = vpop.f32.mrf.mxu1 }
 0x2a9   :  { %v362_v14 = vsel %vm1385_vm1, %v332_v11, -inf }
 0x2aa   :  { %v364_v13 = vsel %vm195_vm14, %v362_v14, -inf }
 0x2ab   :  { %365 = vmax.xlane.f32.xlu0 %v364_v13 }
 0x2b0   :  { %v334_v15 = vpop.f32.mrf.mxu0  ;;  %v472_v16 = vpop.f32.mrf.mxu1 }
 0x2b1   :  { %v1406_v17 = vsel %vm1385_vm1, %v472_v16, -inf }
 0x2b2   :  { %v481_v19 = vsel %vm195_vm14, %v1406_v17, -inf }
 0x2b3   :  { %482 = vmax.xlane.f32.xlu1 %v481_v19 }
 0x2b8   :  { %v449_v20 = vpop.f32.mrf.mxu0  ;;  %v474_v21 = vpop.f32.mrf.mxu1 }
 0x2b9   :  { %v476_v22 = vsel %vm1385_vm1, %v449_v20, -inf }
 0x2ba   :  { %v478_v24 = vsel %vm195_vm14, %v476_v22, -inf }
 0x2bb   :  { %479 = vmax.xlane.f32.xlu2 %v478_v24 }
 0x2c0   :  { %v451_v18 = vpop.f32.mrf.mxu0  ;;  %v586_v25 = vpop.f32.mrf.mxu1 }
 0x2c1   :  { %v1415_v26 = vsel %vm1385_vm1, %v586_v25, -inf }
 0x2c2   :  { %v595_v27 = vsel %vm195_vm14, %v1415_v26, -inf }
 0x2c3   :  { %596 = vmax.xlane.f32.xlu0 %v595_v27 }
 0x2c8   :  { %v563_v28 = vpop.f32.mrf.mxu0  ;;  %v588_v29 = vpop.f32.mrf.mxu1 }
 0x2c9   :  { %v590_v31 = vsel %vm1385_vm1, %v563_v28, -inf }
 0x2ca   :  { %v592_v32 = vsel %vm195_vm14, %v590_v31, -inf }
 0x2cb   :  { %593 = vmax.xlane.f32.xlu2 %v592_v32 }
 0x2d0   :  { %v565_v33 = vpop.f32.mrf.mxu0 }
 0x2d7   :  { %502 = vrot.lane.b32.xlu0 %v1354_v23, %s1233_s19 }
 0x2e3   :  { %388 = vrot.lane.b32.xlu2 %v1354_v23, %s1234_s20 }
 0x306   :  { %v245_v34 = vpop.xlane.xlu2 %244 }
 0x307   :  { %v249_v35 = vsub.f32 %v241_v62, %v245_v34 }
 0x309   :  { %v251_v36 = vmul.f32 1.442695, %v249_v35 }
 0x30b   :  { %1154 = vpow2.f32 %v251_v36 }
 0x311   :  { %v1155_v37 = vpop.eup %1154 }
 0x312   :  { %v255_v38 = vsel %vm195_vm14, %v1155_v37, 0.0 }
 0x313   :  { %256 = vadd.xlane.f32.xlu1 %v255_v38 }
 0x314   :  { %v248_v39 = vpop.xlane.xlu1 %247 }
 0x315   :  { %v250_v42 = vsub.f32 %v242_v4, %v248_v39 }
 0x316   :  { %v369_v45 = vpop.xlane.xlu2 %368 }
 0x317   :  { %v253_v44 = vmul.f32 1.442695, %v250_v42  ;;  %v371_v59 = vsub.f32 %v1397_v7, %v369_v45 }
 0x319   :  { %v374_v60 = vmul.f32 1.442695, %v371_v59 }
 0x31e   :  { %v366_v40 = vpop.xlane.xlu0 %365 }
 0x31f   :  { %v370_v41 = vsub.f32 %v362_v14, %v366_v40 }
 0x321   :  { %v372_v43 = vmul.f32 1.442695, %v370_v41 }
 0x323   :  { %1156 = vpow2.f32 %v372_v43 }
 0x324   :  { %1158 = vpow2.f32 %v253_v44 }
 0x326   :  { %v483_v5 = vpop.xlane.xlu1 %482 }
 0x327   :  { %v485_v6 = vsub.f32 %v1406_v17, %v483_v5 }
 0x329   :  { %v1427_v46 = vpop.eup %1156  ;;  %v488_v7 = vmul.f32 1.442695, %v485_v6 }
 0x32a   :  { %v376_v47 = vsel %vm195_vm14, %v1427_v46, 0.0  ;;  %v1159_v49 = vpop.eup %1158 }
 0x32b   :  { %377 = vadd.xlane.f32.xlu2 %v376_v47  ;;  %v258_v52 = vsel %vm195_vm14, %v1159_v49, 0.0 }
 0x32c   :  { %289 = vrot.lane.b32.xlu1 %v1358_v30, %s1232_s18 }
 0x32e   :  { %v480_v48 = vpop.xlane.xlu2 %479 }
 0x32f   :  { %v484_v50 = vsub.f32 %v476_v22, %v480_v48 }
 0x331   :  { %v486_v51 = vmul.f32 1.442695, %v484_v50 }
 0x333   :  { %1160 = vpow2.f32 %v486_v51  ;;  %259 = vadd.xlane.f32.xlu2 %v258_v52 }
 0x336   :  { %v597_v57 = vpop.xlane.xlu0 %596 }
 0x337   :  { %v599_v12 = vsub.f32 %v1415_v26, %v597_v57 }
 0x339   :  { %v1434_v53 = vpop.eup %1160  ;;  %v602_v14 = vmul.f32 1.442695, %v599_v12 }
 0x33a   :  { %v490_v54 = vsel %vm195_vm14, %v1434_v53, 0.0 }
 0x33b   :  { %491 = vadd.xlane.f32.xlu0 %v490_v54 }
 0x33e   :  { %v594_v55 = vpop.xlane.xlu2 %593 }
 0x33f   :  { %v598_v56 = vsub.f32 %v590_v31, %v594_v55 }
 0x341   :  { %v600_v58 = vmul.f32 1.442695, %v598_v56 }
 0x343   :  { %1162 = vpow2.f32 %v600_v58 }
 0x344   :  { %1164 = vpow2.f32 %v374_v60 }
 0x345   :  { %1166 = vpow2.f32 %v488_v7 }
 0x346   :  { %v389_v19 = vpop.permute.xlu2 %388 }
 0x347   :  { %v394_v24 = vsel %vm272_vm15, %v389_v19, 0  ;;  %v1091_v19 = vld [vmem:[%s1564_s4] sm:$0xff] }
 0x349   :  { %v1439_v61 = vpop.eup %1162  ;;  %v503_v62 = vpop.permute.xlu0 %502 }
 0x34a   :  { %v508_v63 = vsel %vm272_vm15, %v503_v62, 0  ;;  %v604_v1 = vsel %vm195_vm14, %v1439_v61, 0.0  ;;  %v1165_v3 = vpop.eup %1164 }
 0x34b   :  { %517 = vmatpush.bf16.msrb.mxu2 %v508_v63  ;;  %605 = vadd.xlane.f32.xlu0 %v604_v1  ;;  %v379_v4 = vsel %vm195_vm14, %v1165_v3, 0.0  ;;  %v1167_v8 = vpop.eup %1166 }
 0x34c   :  { %409 = vrot.lane.b32.xlu2 %v1358_v30, %s1234_s20  ;;  %v493_v9 = vsel %vm195_vm14, %v1167_v8, 0.0 }
 0x356   :  { %380 = vadd.xlane.f32.xlu1 %v379_v4 }
 0x35f   :  { %637 = vrot.lane.b32.xlu0 %v1358_v30, %s1235_s21 }
 0x36f   :  { %523 = vrot.lane.b32.xlu1 %v1358_v30, %s1233_s19 }
 0x375   :  { %494 = vadd.xlane.f32.xlu2 %v493_v9 }
 0x386   :  { %v257_v11 = vpop.xlane.xlu1 %256 }
 0x387   :  { %1168 = vrcp.f32 %v257_v11 }
 0x388   :  { %1170 = vpow2.f32 %v602_v14 }
 0x38d   :  { %v1169_v13 = vpop.eup %1168  ;;  %616 = vrot.lane.b32.xlu2 %v1354_v23, %s1235_s21 }
 0x38e   :  { %v263_v15 = vmul.f32 %v1169_v13, %v1155_v37  ;;  %v1171_v17 = vpop.eup %1170 }
 0x38f   :  { %v607_v30 = vsel %vm195_vm14, %v1171_v17, 0.0 }
 0x390   :  { %v265_v16 = vpack.c.bf16 %v263_v15, %v263_v15 }
 0x392   :  { %1021 = vmatmul.msk.bf16.vlgmr.msra.gmra.mxu3 %vm195_vm14, %v265_v16 }
 0x399   :  { %608 = vadd.xlane.f32.xlu1 %v607_v30 }
 0x39e   :  { %v378_v20 = vpop.xlane.xlu2 %377  ;;  %v290_v21 = vpop.permute.xlu1 %289 }
 0x39f   :  { %v295_v22 = vsel %vm272_vm15, %v290_v21, 0 }
 0x3a0   :  { %304 = vmatpush.bf16.msrb.mxu3 %v295_v22 }
 0x3a4   :  { %403 = vmatpush.bf16.msra.mxu3 %v394_v24 }
 0x3a6   :  { %v260_v18 = vpop.xlane.xlu2 %259 }
 0x3a7   :  { %1172 = vrcp.f32 %v260_v18 }
 0x3ad   :  { %v1173_v23 = vpop.eup %1172 }
 0x3ae   :  { %v264_v25 = vmul.f32 %v1173_v23, %v1159_v49  ;;  %v492_v26 = vpop.xlane.xlu0 %491  ;;  %v410_v27 = vpop.permute.xlu2 %409 }
 0x3af   :  { %1174 = vrcp.f32 %v492_v26  ;;  %v415_v29 = vsel %vm272_vm15, %v410_v27, 0 }
 0x3b0   :  { %v266_v28 = vpack.c.bf16 %v264_v25, %v264_v25  ;;  %1176 = vrcp.f32 %v378_v20 }
 0x3b2   :  { %1022 = vmatmul.msk.bf16.vlgmr.msrb.gmra.mxu3 %vm195_vm14, %v266_v28 }
 0x3b3   :  { %424 = vmatpush.bf16.msrb.mxu3 %v415_v29 }
 0x3b5   :  { %v1175_v31 = vpop.eup %1174 }
 0x3b6   :  { %v498_v32 = vmul.f32 %v1175_v31, %v1434_v53  ;;  %v1177_v34 = vpop.eup %1176 }
 0x3b7   :  { %v384_v35 = vmul.f32 %v1177_v34, %v1427_v46 }
 0x3b8   :  { %v500_v33 = vpack.c.bf16 %v498_v32, %v498_v32 }
 0x3b9   :  { %v386_v36 = vpack.c.bf16 %v384_v35, %v384_v35  ;;  %v1139_v35 = vld [vmem:[%s1565_s5] ss:$0 sm:$0xff]  ;;  %s1240_s5 = smov [#allocation5]  }
 0x3ba   :  { %1029 = vmatmul.msk.bf16.vlgmr.msrb.gmra.mxu2 %vm195_vm14, %v500_v33  ;;  %s996_s28 = sshll.u32 %s1240_s5, 4  ;;  %s997_s28 = int_to_ptr.vmem [resolvable:$true] %s996_s28 }
 0x3be   :  { %v606_v41 = vpop.xlane.xlu0 %605 }
 0x3c2   :  { %1025 = vmatmul.msk.bf16.vlgmr.msra.gmra.mxu3 %vm195_vm14, %v386_v36 }
 0x3c9   :  { %v381_v37 = vpop.xlane.xlu1 %380 }
 0x3ca   :  { %1178 = vrcp.f32 %v381_v37 }
 0x3cb   :  { %1180 = vrcp.f32 %v606_v41 }
 0x3d0   :  { %v1179_v38 = vpop.eup %1178 }
 0x3d1   :  { %v385_v39 = vmul.f32 %v1179_v38, %v1165_v3  ;;  %v638_v42 = vpop.permute.xlu0 %637  ;;  %v1181_v47 = vpop.eup %1180 }
 0x3d2   :  { %v643_v45 = vsel %vm272_vm15, %v638_v42, 0  ;;  %v612_v49 = vmul.f32 %v1181_v47, %v1439_v61 }
 0x3d3   :  { %v387_v40 = vpack.c.bf16 %v385_v39, %v385_v39 }
 0x3d4   :  { %v614_v54 = vpack.c.bf16 %v612_v49, %v612_v49 }
 0x3d5   :  { %1026 = vmatmul.msk.bf16.vlgmr.msrb.gmra.mxu3 %vm195_vm14, %v387_v40 }
 0x3e1   :  { %v524_v43 = vpop.permute.xlu1 %523 }
 0x3e2   :  { %v529_v44 = vsel %vm272_vm15, %v524_v43, 0 }
 0x3e3   :  { %538 = vmatpush.bf16.msra.mxu3 %v529_v44 }
 0x3e7   :  { %652 = vmatpush.bf16.msrb.mxu3 %v643_v45 }
 0x3e8   :  { %v495_v46 = vpop.xlane.xlu2 %494 }
 0x3e9   :  { %1182 = vrcp.f32 %v495_v46 }
 0x3ef   :  { %v1183_v48 = vpop.eup %1182 }
 0x3f0   :  { %v499_v50 = vmul.f32 %v1183_v48, %v1167_v8  ;;  %v617_v51 = vpop.permute.xlu2 %616 }
 0x3f1   :  { %v622_v52 = vsel %vm272_vm15, %v617_v51, 0 }
 0x3f2   :  { %v501_v53 = vpack.c.bf16 %v499_v50, %v499_v50  ;;  %631 = vmatpush.bf16.msra.mxu2 %v622_v52 }
 0x3f4   :  { %1030 = vmatmul.msk.bf16.vlgmr.msra.gmra.mxu3 %vm195_vm14, %v501_v53 }
 0x3f5   :  { %1033 = vmatmul.msk.bf16.vlgmr.msra.gmra.mxu2 %vm195_vm14, %v614_v54 }
 0x40c   :  { %v609_v55 = vpop.xlane.xlu1 %608 }
 0x40d   :  { %1184 = vrcp.f32 %v609_v55 }
 0x413   :  { %v1185_v56 = vpop.eup %1184 }
 0x414   :  { %v613_v57 = vmul.f32 %v1185_v56, %v1171_v17  ;;  %v1092_v17 = vld [vmem:[%s1564_s4 + $0x8] sm:$0xff] }
 0x415   :  { %v285_v58 = vpop.f32.mrf.mxu3  ;;  %720 = vmatpush.bf16.msra.mxu0 %v1092_v17 }
 0x416   :  { %v615_v59 = vpack.c.bf16 %v613_v57, %v613_v57 }
 0x418   :  { %1034 = vmatmul.msk.bf16.vlgmr.msrb.gmra.mxu3 %vm195_vm14, %v615_v59 }
 0x419   :  { %721 = vmatpush.bf16.msra.mxu0 %v1091_v19 }
 0x41d   :  { %v287_v60 = vpop.f32.mrf.mxu3 }
 0x435   :  { %v306_v61 = vpop.f32.mrf.mxu3 }
 0x43d   :  { %v308_v62 = vpop.f32.mrf.mxu3  ;;  %v519_v63 = vpop.f32.mrf.mxu2 }
 0x445   :  { %v405_v1 = vpop.f32.mrf.mxu3  ;;  %v521_v3 = vpop.f32.mrf.mxu2 }
 0x44d   :  { %v407_v4 = vpop.f32.mrf.mxu3 }
 0x458   :  { %v426_v5 = vpop.f32.mrf.mxu3 }
 0x459   :  { %v1122_v6 = vpack.i.bf16 %v426_v5, %v405_v1 }
 0x45b   :  { %1123 = vrot.lane.b32.xlu2 %v1122_v6, %s1236_s22 }
 0x460   :  { %v428_v7 = vpop.f32.mrf.mxu3 }
 0x477   :  { %v540_v8 = vpop.f32.mrf.mxu3 }
 0x478   :  { %v1127_v9 = vpack.i.bf16 %v540_v8, %v519_v63  ;;  %v633_v11 = vpop.f32.mrf.mxu2 }
 0x47a   :  { %1128 = vrot.lane.b32.xlu2 %v1127_v9, %s1237_s23 }
 0x47f   :  { %v542_v12 = vpop.f32.mrf.mxu3 }
 0x480   :  { %v635_v14 = vpop.f32.mrf.mxu2 }
 0x481   :  { %v1094_v14 = vld [vmem:[%s1568_s8] sm:$0xff] }
 0x49b   :  { %v654_v13 = vpop.f32.mrf.mxu3 }
 0x49c   :  { %v1132_v15 = vpack.i.bf16 %v654_v13, %v633_v11  ;;  %v1095_v11 = vld [vmem:[%s1568_s8 + $0x8] sm:$0xff]  ;;  %s998_s8 = sshll.u32 %s1572_s12, 4  ;;  %s999_s8 = int_to_ptr.hbm [resolvable:$true] %s998_s8 }
 0x49d   :  { %864 = vmatpush.bf16.msra.mxu1 %v1095_v11 }
 0x49e   :  { %1133 = vrot.lane.b32.xlu1 %v1132_v15, %s1238_s24 }
 0x4a1   :  { %865 = vmatpush.bf16.msra.mxu1 %v1094_v14 }
 0x4a3   :  { %v656_v16 = vpop.f32.mrf.mxu3 }
 0x4b5   :  { %v1124_v30 = vpop.permute.xlu2 %1123 }
 0x4b6   :  { %v1126_v21 = vunpack.i.h.bf16 %v1124_v30  ;;  %v1125_v22 = vunpack.i.l.bf16 %v1124_v30 }
 0x4b8   :  { %v683_v25 = vsel %vm195_vm14, %v306_v61, %v1126_v21  ;;  %v682_v26 = vsel %vm195_vm14, %v285_v58, %v1125_v22 }
 0x4d4   :  { %v1129_v20 = vpop.permute.xlu2 %1128 }
 0x4d5   :  { %v1131_v24 = vunpack.i.h.bf16 %v1129_v20  ;;  %v1130_v18 = vunpack.i.l.bf16 %v1129_v20 }
 0x4d7   :  { %v686_v29 = vsel %vm684_vm2, %v683_v25, %v1131_v24  ;;  %v685_v31 = vsel %vm684_vm2, %v682_v26, %v1130_v18  ;;  %v1140_v26 = vld [vmem:[%s1566_s6] ss:$0 sm:$0xff] }
 0x510   :  { %v1134_v23 = vpop.permute.xlu1 %1133 }
 0x511   :  { %v1136_v27 = vunpack.i.h.bf16 %v1134_v23  ;;  %v1135_v28 = vunpack.i.l.bf16 %v1134_v23 }
 0x513   :  { %v689_v32 = vsel %vm687_vm3, %v686_v29, %v1136_v27  ;;  %v688_v33 = vsel %vm687_vm3, %v685_v31, %v1135_v28  ;;  %v1141_v31 = vld [vmem:[%s1567_s7] ss:$0 sm:$0xff] }
 0x514   :  { %v690_v34 = vpack.c.bf16 %v689_v32, %v688_v33 }
 0x516   :  { %1043 = vmatmul.msk.bf16.vlgmr.msra.gmra.mxu0 %vm51_vm0, %v690_v34 }
 0x593   :  { %v723_v36 = vpop.f32.mrf.mxu0 }
 0x594   :  { %v724_v37 = vadd.f32 %v1139_v35, %v723_v36 }
 0x596   :  { %v728_v38 = vadd.f32 %v724_v37, %v1310_v0 }
 0x598   :  { %730 = vst.msk [vmem:[#allocation2] sm:$0xff] %vm51_vm0, %v728_v38  ;;  %v734_v39 = vsel %vm51_vm0, %v728_v38, 0.0 }
 0x599   :  { %735 = vadd.xlane.f32.xlu2 %v734_v39 }
 0x59b   :  { %v725_v40 = vpop.f32.mrf.mxu0 }
 0x59c   :  { %v726_v41 = vadd.f32 %v1139_v35, %v725_v40 }
 0x59e   :  { %v729_v42 = vadd.f32 %v726_v41, %v1317_v2 }
 0x5a0   :  { %731 = vst.msk [vmem:[#allocation2 + $0x8] sm:$0xff] %vm51_vm0, %v729_v42  ;;  %v737_v43 = vsel %vm51_vm0, %v729_v42, 0.0 }
 0x5a1   :  { %738 = vadd.xlane.f32.xlu0 %v737_v43 }
 0x60c   :  { %v736_v44 = vpop.xlane.xlu2 %735 }
 0x60d   :  { %v740_v45 = vmul.f32 %v736_v44, %v1321_v10 }
 0x60f   :  { %v1492_v46 = vsub.f32 %v728_v38, %v740_v45 }
 0x611   :  { %v744_v0 = vmul.f32 %v1492_v46, %v1492_v46 }
 0x613   :  { %v746_v47 = vsel %vm51_vm0, %v744_v0, 0.0 }
 0x614   :  { %v739_v48 = vpop.xlane.xlu0 %738  ;;  %747 = vadd.xlane.f32.xlu1 %v746_v47 }
 0x615   :  { %v741_v49 = vmul.f32 %v739_v48, %v1321_v10  ;;  %v1103_v48 = vld [vmem:[%s1570_s10 + $0x38] sm:$0xff] }
 0x616   :  { %957 = vmatpush.bf16.msrb.mxu2 %v1103_v48 }
 0x617   :  { %v1498_v2 = vsub.f32 %v729_v42, %v741_v49  ;;  %v1102_v49 = vld [vmem:[%s1570_s10 + $0x30] sm:$0xff] }
 0x619   :  { %v745_v50 = vmul.f32 %v1498_v2, %v1498_v2 }
 0x61a   :  { %958 = vmatpush.bf16.msrb.mxu2 %v1102_v49 }
 0x61b   :  { %v749_v51 = vsel %vm51_vm0, %v745_v50, 0.0  ;;  %v1100_v50 = vld [vmem:[%s1570_s10 + $0x20] sm:$0xff] }
 0x61c   :  { %750 = vadd.xlane.f32.xlu2 %v749_v51  ;;  %v1099_v51 = vld [vmem:[%s1570_s10 + $0x18] sm:$0xff] }
 0x687   :  { %v748_v52 = vpop.xlane.xlu1 %747 }
 0x688   :  { %v752_v53 = vmul.f32 %v748_v52, %v1321_v10  ;;  %v1098_v52 = vld [vmem:[%s1570_s10 + $0x10] sm:$0xff] }
 0x68a   :  { %v754_v54 = vadd.f32 1e-05, %v752_v53  ;;  %v1097_v53 = vld [vmem:[%s1570_s10 + $0x8] sm:$0xff] }
 0x68c   :  { %1186 = vrsqrt.f32 %v754_v54  ;;  %vm763_vm4 = vcmp.eq.f32.partialorder %v754_v54, inf  ;;  %v766_v6 = vand.u32 2147483648, %v754_v54  ;;  %vm765_vm5 = vcmp.eq.f32.partialorder %v754_v54, 0.0 }
 0x68f   :  { %v751_v55 = vpop.xlane.xlu2 %750 }
 0x690   :  { %v753_v56 = vmul.f32 %v751_v55, %v1321_v10  ;;  %v1142_v55 = vld [vmem:[%s1569_s9] ss:$0 sm:$0xff] }
 0x692   :  { %v1187_v57 = vpop.eup %1186  ;;  %v755_v58 = vadd.f32 1e-05, %v753_v56 }
 0x693   :  { %v757_v59 = vmul.f32 %v1187_v57, %v754_v54 }
 0x694   :  { %1188 = vrsqrt.f32 %v755_v58  ;;  %vm775_vm6 = vcmp.eq.f32.partialorder %v755_v58, inf  ;;  %v778_v16 = vand.u32 2147483648, %v755_v58  ;;  %vm777_vm7 = vcmp.eq.f32.partialorder %v755_v58, 0.0 }
 0x695   :  { %v758_v60 = vmul.f32 %v1187_v57, %v757_v59  ;;  %v1239_v59 = vmov 0.0  }
 0x696   :  { %825 = vst.msk [vmem:[#allocation4] sm:$0xff] %vm51_vm0, %v1239_v59 }
 0x697   :  { %v759_v61 = vmul.f32 0.5, %v758_v60  ;;  %826 = vst.msk [vmem:[#allocation4 + $0x8] sm:$0xff] %vm51_vm0, %v1239_v59 }
 0x699   :  { %v760_v62 = vsub.f32 1.5, %v759_v61 }
 0x69a   :  { %v1189_v63 = vpop.eup %1188 }
 0x69b   :  { %v761_v1 = vmul.f32 %v1187_v57, %v760_v62  ;;  %v769_v3 = vmul.f32 %v1189_v63, %v755_v58 }
 0x69d   :  { %v762_v4 = vmul.f32 %v761_v1, %v754_v54  ;;  %v770_v5 = vmul.f32 %v1189_v63, %v769_v3 }
 0x69f   :  { %v764_v7 = vsel %vm763_vm4, %v754_v54, %v762_v4  ;;  %v771_v8 = vmul.f32 0.5, %v770_v5  ;;  %v1096_v54 = vld [vmem:[%s1570_s10] sm:$0xff] }
 0x6a0   :  { %v767_v9 = vsel %vm765_vm5, %v766_v6, %v764_v7 }
 0x6a1   :  { %1190 = vrcp.f32 %v767_v9  ;;  %v772_v10 = vsub.f32 1.5, %v771_v8  ;;  %v791_v21 = vand.u32 2147483648, %v767_v9  ;;  %v789_v24 = vand.u32 2147483647, %v767_v9 }
 0x6a2   :  { %vm785_vm9 = vweird.f32 %v767_v9 }
 0x6a3   :  { %v773_v12 = vmul.f32 %v1189_v63, %v772_v10  ;;  %v792_v23 = vor.u32 1.1754944e-38, %v791_v21  ;;  %vm790_vm11 = vcmp.eq.f32.partialorder %v789_v24, 8.507059e+37  ;;  %v891_v21 = vld [vmem:[#allocation4 + $0x8] sm:$0xff] }
 0x6a5   :  { %v774_v13 = vmul.f32 %v773_v12, %v755_v58 }
 0x6a7   :  { %v1191_v15 = vpop.eup %1190  ;;  %v776_v19 = vsel %vm775_vm6, %v755_v58, %v774_v13 }
 0x6a8   :  { %v781_v17 = vmul.f32 %v1191_v15, %v767_v9  ;;  %v779_v30 = vsel %vm777_vm7, %v778_v16, %v776_v19  ;;  %vm786_vm8 = vweird.f32 %v1191_v15  ;;  %v890_v19 = vld [vmem:[#allocation4] sm:$0xff] }
 0x6a9   :  { %1192 = vrcp.f32 %v779_v30  ;;  %vm787_vm10 = vmor %vm785_vm9, %vm786_vm8  ;;  %v806_v35 = vand.u32 2147483648, %v779_v30  ;;  %v804_v37 = vand.u32 2147483647, %v779_v30  ;;  %vm800_vm14 = vweird.f32 %v779_v30 }
 0x6aa   :  { %v782_v20 = vsub.f32 1.0, %v781_v17 }
 0x6ab   :  { %v807_v41 = vor.u32 1.1754944e-38, %v806_v35  ;;  %vm805_vm1 = vcmp.eq.f32.partialorder %v804_v37, 8.507059e+37 }
 0x6ac   :  { %v783_v22 = vmul.f32 %v1191_v15, %v782_v20 }
 0x6ae   :  { %v784_v18 = vadd.f32 %v1191_v15, %v783_v22 }
 0x6af   :  { %v1193_v25 = vpop.eup %1192 }
 0x6b0   :  { %v788_v27 = vsel %vm787_vm10, %v1191_v15, %v784_v18  ;;  %v796_v29 = vmul.f32 %v1193_v25, %v779_v30  ;;  %vm801_vm12 = vweird.f32 %v1193_v25  ;;  %v1143_v18 = vld [vmem:[%s1571_s11] ss:$0 sm:$0xff]  ;;  %s1241_s11 = smov 128  }
 0x6b1   :  { %v793_v28 = vsel %vm790_vm11, %v792_v23, %v788_v27  ;;  %vm802_vm15 = vmor %vm800_vm14, %vm801_vm12  ;;  %v978_v23 = vld [vmem:[#allocation2] sm:$0xff] }
 0x6b2   :  { %v794_v32 = vmul.f32 %v793_v28, %v1492_v46  ;;  %v797_v33 = vsub.f32 1.0, %v796_v29  ;;  %v979_v28 = vld [vmem:[#allocation2 + $0x8] sm:$0xff] }
 0x6b4   :  { %v813_v34 = vmul.f32 %v1140_v26, %v794_v32  ;;  %v798_v36 = vmul.f32 %v1193_v25, %v797_v33 }
 0x6b6   :  { %v818_v38 = vadd.f32 %v1141_v31, %v813_v34  ;;  %v799_v39 = vadd.f32 %v1193_v25, %v798_v36 }
 0x6b8   :  { %v820_v40 = vpack.c.bf16 %v818_v38, %v818_v38  ;;  %v803_v42 = vsel %vm802_vm15, %v1193_v25, %v799_v39 }
 0x6b9   :  { %v808_v43 = vsel %vm805_vm1, %v807_v41, %v803_v42 }
 0x6ba   :  { %823 = vst.msk [vmem:[#allocation3] sm:$0xf] %vm822_vm13, %v820_v40  ;;  %v809_v44 = vmul.f32 %v808_v43, %v1498_v2  ;;  %v1101_v2 = vld [vmem:[%s1570_s10 + $0x28] sm:$0xff] }
 0x6bb   :  { %959 = vmatpush.bf16.msrb.mxu2 %v1101_v2 }
 0x6bc   :  { %v814_v45 = vmul.f32 %v1140_v26, %v809_v44 }
 0x6be   :  { %v819_v46 = vadd.f32 %v1141_v31, %v814_v45 }
 0x6bf   :  { %960 = vmatpush.bf16.msrb.mxu2 %v1100_v50 }
 0x6c0   :  { %v821_v0 = vpack.c.bf16 %v819_v46, %v819_v46 }
 0x6c2   :  { %824 = vst.msk [vmem:[#allocation3 + $0x4] sm:$0xf] %vm822_vm13, %v821_v0 }
 0x6c3   :  { %961 = vmatpush.bf16.msrb.mxu2 %v1099_v51 }
 0x6c7   :  { %962 = vmatpush.bf16.msrb.mxu2 %v1098_v52 }
 0x6c9   :  { %v1093_v47 = vld [vmem:[#allocation3] sm:$0xff] }
 0x6ca   :  { %1056 = vmatmul.msk.bf16.vlgmr.msra.gmra.mxu1 %vm51_vm0, %v1093_v47 }
 0x6cb   :  { %963 = vmatpush.bf16.msrb.mxu2 %v1097_v53 }
 0x6cf   :  { %964 = vmatpush.bf16.msrb.mxu2 %v1096_v54 }
 0x747   :  { %v867_v56 = vpop.f32.mrf.mxu1 }
 0x748   :  { %v868_v57 = vadd.f32 %v1142_v55, %v867_v56 }
 0x74a   :  { %v874_v58 = vmul.f32 %v868_v57, %v868_v57  ;;  %v872_v12 = vmul.f32 0.5, %v868_v57 }
 0x74c   :  { %v876_v60 = vmul.f32 %v874_v58, %v868_v57 }
 0x74e   :  { %v878_v61 = vmul.f32 0.044715, %v876_v60 }
 0x74f   :  { %v869_v62 = vpop.f32.mrf.mxu1 }
 0x750   :  { %v880_v63 = vadd.f32 %v878_v61, %v868_v57  ;;  %v870_v1 = vadd.f32 %v1142_v55, %v869_v62 }
 0x752   :  { %v875_v3 = vmul.f32 %v870_v1, %v870_v1  ;;  %v882_v4 = vmul.f32 0.7978845, %v880_v63  ;;  %v873_v14 = vmul.f32 0.5, %v870_v1 }
 0x754   :  { %v877_v5 = vmul.f32 %v875_v3, %v870_v1  ;;  %1194 = vtanh.f32 %v882_v4 }
 0x756   :  { %v879_v6 = vmul.f32 0.044715, %v877_v5 }
 0x758   :  { %v881_v7 = vadd.f32 %v879_v6, %v870_v1 }
 0x75a   :  { %v883_v8 = vmul.f32 0.7978845, %v881_v7  ;;  %v1195_v9 = vpop.eup %1194 }
 0x75b   :  { %v886_v10 = vadd.f32 1.0, %v1195_v9 }
 0x75c   :  { %1196 = vtanh.f32 %v883_v8 }
 0x75d   :  { %v888_v15 = vmul.f32 %v886_v10, %v872_v12 }
 0x762   :  { %v1197_v11 = vpop.eup %1196 }
 0x763   :  { %v887_v13 = vadd.f32 1.0, %v1197_v11 }
 0x765   :  { %v889_v16 = vmul.f32 %v887_v13, %v873_v14 }
 0x767   :  { %v892_v17 = vpack.c.bf16 %v889_v16, %v888_v15 }
 0x769   :  { %965 = vmatmul.bf16.vlgmr.msrb.gmra.mxu2 %v892_v17 }
 0x7ec   :  { %v966_v30 = vpop.f32.mrf.mxu2 }
 0x7ed   :  { %v971_v20 = vadd.f32 %v966_v30, %v890_v19 }
 0x7ef   :  { %973 = vst.msk [vmem:[#allocation4] sm:$0xff] %vm51_vm0, %v971_v20 }
 0x7f4   :  { %v968_v22 = vpop.f32.mrf.mxu2 }
 0x7f5   :  { %v972_v24 = vadd.f32 %v968_v22, %v891_v21 }
 0x7f6   :  { %v980_v25 = vld [vmem:[#allocation4] sm:$0xff] }
 0x7f7   :  { %974 = vst.msk [vmem:[#allocation4 + $0x8] sm:$0xff] %vm51_vm0, %v972_v24  ;;  %v982_v26 = vadd.f32 %v980_v25, %v978_v23 }
 0x7f9   :  { %v988_v27 = vadd.f32 %v1143_v18, %v982_v26 }
 0x7fb   :  { %990 = vst.msk [vmem:[#allocation5] sm:$0xff] %vm51_vm0, %v988_v27 }
 0x7fe   :  { %v981_v29 = vld [vmem:[#allocation4 + $0x8] sm:$0xff] }
 0x7ff   :  { %v983_v31 = vadd.f32 %v981_v29, %v979_v28 }
 0x801   :  { %v989_v32 = vadd.f32 %v1143_v18, %v983_v31 }
 0x803   :  { %991 = vst.msk [vmem:[#allocation5 + $0x8] sm:$0xff] %vm51_vm0, %v989_v32 }
 0x804   :  { %1004 = dma.vmem_to_hbm [thread:$0]  %s997_s28, 256, %s999_s8, [#allocation6], %s1241_s11, %s1241_s11, %s1236_s22  }
 0x805   :  { %1222 = dma.done.wait [#allocation6], 256  }
 0x806   :  { %1223 = vsyncadd [#allocation6], 4294967040 }
 0x807   :  { %1009 = vsyncpa [#allocation6], 1 }

</bundles_post_ra>
